<compile_context>
chip_gen: v5e
topology: v5e:2x2
jax: 0.10.0
libtpu: 0.0.40
codegen_flags: <defaults>
</compile_context>

<pallas_src>
import functools

import numpy as np
import jax
import jax.numpy as jnp
from jax.experimental import pallas as pl
from jax.experimental.pallas import tpu as pltpu

# --- synthetic "config" -------------------------------------------------------
BATCH       = 4        # number of agents; linear_3.input_dim == output_dim == BATCH
EMB_DIM     = 32       # config.emb_dim
HIDDEN_DIM  = 32       # config.hidden_dim
NUM_LAYERS  = 2        # config.num_layers
SEQ_LEN     = 8        # config.seq_len
MLP_HIDDEN  = 64       # hidden width of predicted_trajectories_generator
POS_DIM     = 2        # MLP output (2-D relative position)

HALF        = BATCH // 2
SLAB_LANES  = 128

assert EMB_DIM == HIDDEN_DIM
assert BATCH == 4 and POS_DIM == 2        # corrector pair-fold below is written for B == 4
assert 4 * HIDDEN_DIM == SLAB_LANES and 2 * MLP_HIDDEN <= SLAB_LANES

# Wrapper-side row permutation so that in-kernel rows are [agent0, agent2, agent1, agent3]:
# rows 0:2 then carry the "first agent of each pair" (corrector columns 0:2) and rows 2:4
# the "second agent of each pair" (columns 2:4), making the epilogue slices contiguous.
_PAIR_PERM = (0, 2, 1, 3)


# ------------------------------------------------------------------------------
# Weight-slab layout (one lane-dense (rows, 128) f32 array, one DMA)
# ------------------------------------------------------------------------------
def _build_slab_layout():
    segs, row = {}, 0

    def add(name, nrows, nlanes, align):
        nonlocal row
        row = ((row + align - 1) // align) * align
        segs[name] = (row, nrows, nlanes)
        row += nrows

    # 8-aligned weight segments
    add("w_x0", POS_DIM,        4 * HIDDEN_DIM, 8)   # spatial_emb @ W_ih(l0)      (2, 128)
    add("w_h0", HIDDEN_DIM,     4 * HIDDEN_DIM, 8)   # hidden2pos  @ W_ih(l0)      (32, 128)
    add("w_g1", HIDDEN_DIM,     4 * HIDDEN_DIM, 8)   # W_ih(l1)                    (32, 128)
    add("w_m1", 2 * HIDDEN_DIM, 2 * MLP_HIDDEN, 8)   # blockdiag(h2p@W1, h2p@W1)   (64, 128)
    add("w_2c", 2 * MLP_HIDDEN, BATCH,          8)   # [W2@Wc[0:2]; W2@Wc[2:4]]    (128, 4)
    # bias rows (single rows, packed consecutively)
    add("b_x0", 1, 4 * HIDDEN_DIM, 1)
    add("b_h0", 1, 4 * HIDDEN_DIM, 1)
    add("b_g1", 1, 4 * HIDDEN_DIM, 1)
    add("b_m1", 1, 2 * MLP_HIDDEN, 1)
    add("b_out", 1, BATCH, 1)
    return segs, ((row + 7) // 8) * 8


_SEG, _SLAB_ROWS = _build_slab_layout()


# ------------------------------------------------------------------------------
# Fused decoder kernel
# ------------------------------------------------------------------------------
def _decoder_kernel(x_ref, w_ref, out_ref):
    # x_ref  : (B, 2)            seed positions, rows pre-permuted to [0, 2, 1, 3]
    # w_ref  : (_SLAB_ROWS, 128) packed weight slab (see _build_slab_layout)
    # out_ref: (2*S, B)          corrector output in its natural (view(-1, B)) layout
    f32 = jnp.float32
    dot = functools.partial(jnp.dot, preferred_element_type=f32,
                            precision=jax.lax.Precision.DEFAULT)

    def seg(name):                      # static slab slice -> zero-cost ref view
        r0, nr, nl = _SEG[name]
        return w_ref[r0:r0 + nr, 0:nl]

    H = HIDDEN_DIM

    def lstm_cell(gates):
        # zero (h, c) is re-fed every step in the reference module, so the W_hh term
        # and the forget-gate path vanish identically (f-gate lanes ride along unused).
        i_g = jax.nn.sigmoid(gates[:, 0 * H:1 * H])
        g_g = jnp.tanh(gates[:, 2 * H:3 * H])
        o_g = jax.nn.sigmoid(gates[:, 3 * H:4 * H])
        return o_g * jnp.tanh(i_g * g_g)

    # ---- recurrence: per step only TWO dependent (B, 4H) gate matmuls --------
    w_h0, b_h0 = seg("w_h0"), seg("b_h0")           # hidden2pos folded into layer-0 gates
    w_g1, b_g1 = seg("w_g1"), seg("b_g1")
    x = x_ref[...]
    gates = dot(x, seg("w_x0")) + seg("b_x0")       # spatial_embedding folded into step-0 gates

    h_a, h_b = [], []                               # per-step top-layer h, split per pair slot
    for t in range(SEQ_LEN):                        # static unrolled decode loop
        h = lstm_cell(gates)                        # layer 0
        h = lstm_cell(dot(h, w_g1) + b_g1)          # layer 1 (top); inter-layer dropout = eval
        h_a.append(h[0:HALF, :])                    # agents (0, 2) -> corrector cols 0:2
        h_b.append(h[HALF:BATCH, :])                # agents (1, 3) -> corrector cols 2:4
        if t + 1 < SEQ_LEN:
            gates = dot(h, w_h0) + b_h0             # next step's layer-0 gates

    # ---- epilogue: MLP head batched over all steps; layer-2 + corrector folded
    h_ab = jnp.concatenate(
        [jnp.concatenate(h_a, axis=0), jnp.concatenate(h_b, axis=0)], axis=1)   # (2S, 2H)
    hid = jnp.maximum(dot(h_ab, seg("w_m1")) + seg("b_m1"), 0.0)                # (2S, 2M)
    out_ref[...] = (dot(hid, seg("w_2c")) + seg("b_out")).astype(out_ref.dtype)  # (2S, B)


_VMEM = functools.partial(pl.BlockSpec, memory_space=pltpu.MemorySpace.VMEM)


def decoder_forward(input_data, weight_slab):
    """input_data: (BATCH, 2) float32. Returns (pred_traj_fake_rel, h)."""
    x_perm = input_data[jnp.asarray(_PAIR_PERM), :]     # free host-side row permutation
    corrected = pl.pallas_call(
        _decoder_kernel,
        out_shape=jax.ShapeDtypeStruct((2 * SEQ_LEN, BATCH), jnp.float32),
        in_specs=[_VMEM(), _VMEM()],
        out_specs=_VMEM(),
    )(x_perm, weight_slab)

    # (2S, B) is the row-major flattening of (S, B, 2): free reshape, original agent order.
    pred_traj_fake_rel = corrected.reshape(SEQ_LEN, BATCH, POS_DIM)
    # state_tuple[0] is never updated in the reference forward -> zeros
    h = jnp.zeros((NUM_LAYERS, BATCH, HIDDEN_DIM), jnp.float32)
    return pred_traj_fake_rel, h


# ------------------------------------------------------------------------------
# Parameters (raw, PyTorch-like layout) and host-side packing / folding
# ------------------------------------------------------------------------------
def make_params(key):
    keys = jax.random.split(key, 16)
    n = lambda k, shape, s=0.1: (s * jax.random.normal(k, shape)).astype(jnp.float32)
    return {
        "w_sp":   n(keys[0], (2, EMB_DIM)),
        "b_sp":   n(keys[1], (1, EMB_DIM)),
        "w_ih":   n(keys[2], (NUM_LAYERS, 4, EMB_DIM, HIDDEN_DIM)),   # gate order i,f,g,o
        "b_ih":   n(keys[3], (NUM_LAYERS, 4, 1, HIDDEN_DIM)),
        "b_hh":   n(keys[4], (NUM_LAYERS, 4, 1, HIDDEN_DIM)),
        "w_h2p":  n(keys[5], (HIDDEN_DIM, EMB_DIM)),
        "b_h2p":  n(keys[6], (1, EMB_DIM)),
        "w_mlp1": n(keys[7], (EMB_DIM, MLP_HIDDEN)),
        "b_mlp1": n(keys[8], (1, MLP_HIDDEN)),
        "w_mlp2": n(keys[9], (MLP_HIDDEN, POS_DIM)),
        "b_mlp2": n(keys[10], (1, POS_DIM)),
        "w_ac":   n(keys[11], (BATCH, BATCH)),
        "b_ac":   n(keys[12], (1, BATCH)),
    }


def pack_params(p):
    """One-time host-side packing: all algebraic folds done in float64, cast to f32."""
    f = lambda a: np.asarray(a, np.float64)
    w_ih, b_ih, b_hh = f(p["w_ih"]), f(p["b_ih"]), f(p["b_hh"])
    # (L,4,E,H) -> lane-dense (L, E, 4H), gate order i,f,g,o; pre-sum b_ih + b_hh.
    wg = w_ih.transpose(0, 2, 1, 3).reshape(NUM_LAYERS, EMB_DIM, 4 * HIDDEN_DIM)
    bg = (b_ih + b_hh).transpose(0, 2, 1, 3).reshape(NUM_LAYERS, 1, 4 * HIDDEN_DIM)
    w_sp, b_sp = f(p["w_sp"]), f(p["b_sp"])
    w_h2p, b_h2p = f(p["w_h2p"]), f(p["b_h2p"])
    w1, b1 = f(p["w_mlp1"]), f(p["b_mlp1"])
    w2, b2 = f(p["w_mlp2"]), f(p["b_mlp2"])
    wc, bc = f(p["w_ac"]), f(p["b_ac"])

    # spatial_embedding / hidden2pos folded into the layer-0 gate matmul
    w_x0 = w_sp @ wg[0];   b_x0 = b_sp @ wg[0] + bg[0]
    w_h0 = w_h2p @ wg[0];  b_h0 = b_h2p @ wg[0] + bg[0]
    # hidden2pos folded into MLP layer 1; block-diag duplicate for the (A|B) pair layout
    w_m1 = w_h2p @ w1
    b_m1 = b_h2p @ w1 + b1
    w_m1x2 = np.zeros((2 * HIDDEN_DIM, 2 * MLP_HIDDEN), np.float64)
    w_m1x2[:HIDDEN_DIM, :MLP_HIDDEN] = w_m1
    w_m1x2[HIDDEN_DIM:, MLP_HIDDEN:] = w_m1
    b_m1x2 = np.concatenate([b_m1, b_m1], axis=1)
    # MLP layer 2 + agents-corrector (view(-1,B) -> Linear(B,B) -> view) folded into one matrix:
    #   out(2S,B) = [hid_A | hid_B] @ [W2@Wc[0:2,:]; W2@Wc[2:4,:]] + (b2@(Wc[0:2]+Wc[2:4]) + bc)
    w_2c = np.concatenate([w2 @ wc[0:2, :], w2 @ wc[2:4, :]], axis=0)
    b_out = b2 @ (wc[0:2, :] + wc[2:4, :]) + bc

    slab = np.zeros((_SLAB_ROWS, SLAB_LANES), np.float64)

    def put(name, arr):
        r0, nr, nl = _SEG[name]
        assert arr.shape == (nr, nl), (name, arr.shape, (nr, nl))
        slab[r0:r0 + nr, :nl] = arr

    put("w_x0", w_x0); put("b_x0", b_x0)
    put("w_h0", w_h0); put("b_h0", b_h0)
    put("w_g1", wg[1]); put("b_g1", bg[1])
    put("w_m1", w_m1x2); put("b_m1", b_m1x2)
    put("w_2c", w_2c); put("b_out", b_out)
    return jnp.asarray(slab, jnp.float32)


# ------------------------------------------------------------------------------
# Pure-JAX reference mirroring the PyTorch forward (for a correctness check)
# ------------------------------------------------------------------------------
def decoder_reference(input_data, p):
    emb = input_data @ p["w_sp"] + p["b_sp"]
    rels = []
    for _ in range(SEQ_LEN):
        h = emb
        for l in range(NUM_LAYERS):   # zero (h, c) re-fed every step, as in the module
            i_g = jax.nn.sigmoid(h @ p["w_ih"][l, 0] + p["b_ih"][l, 0] + p["b_hh"][l, 0])
            g_g = jnp.tanh(h @ p["w_ih"][l, 2] + p["b_ih"][l, 2] + p["b_hh"][l, 2])
            o_g = jax.nn.sigmoid(h @ p["w_ih"][l, 3] + p["b_ih"][l, 3] + p["b_hh"][l, 3])
            h = o_g * jnp.tanh(i_g * g_g)
        emb = h @ p["w_h2p"] + p["b_h2p"]
        hid = jnp.maximum(emb @ p["w_mlp1"] + p["b_mlp1"], 0.0)
        rels.append(hid @ p["w_mlp2"] + p["b_mlp2"])
    traj = jnp.stack(rels, axis=0)                      # (S, B, 2)
    v = traj.reshape(-1, BATCH)                         # (2S, B)  == torch .view
    c = v @ p["w_ac"] + p["b_ac"]
    out = c.reshape(SEQ_LEN, BATCH, -1)
    return out, jnp.zeros((NUM_LAYERS, BATCH, HIDDEN_DIM), jnp.float32)


if __name__ == "__main__":
    root = jax.random.PRNGKey(0)
    k_params, k_input = jax.random.split(root)
    params = make_params(k_params)
    weight_slab = pack_params(params)
    input_data = jax.random.normal(k_input, (BATCH, 2), dtype=jnp.float32)

    fwd = jax.jit(decoder_forward)
    pred_traj, h = fwd(input_data, weight_slab)
    jax.block_until_ready((pred_traj, h))

    assert pred_traj.shape == (SEQ_LEN, BATCH, POS_DIM), pred_traj.shape
    assert h.shape == (NUM_LAYERS, BATCH, HIDDEN_DIM), h.shape
    assert bool(jnp.all(jnp.isfinite(pred_traj)))

    # Kernel and reference both run bf16-pass (DEFAULT-precision) MXU dots, with the
    # kernel using host-folded weights, so allow a correspondingly looser tolerance.
    ref_traj, _ = decoder_reference(input_data, params)
    np.testing.assert_allclose(np.asarray(pred_traj), np.asarray(ref_traj),
                               rtol=2e-2, atol=2e-2)
    print("KERNEL_OK")
</pallas_src>

<mosaic_0001>
module attributes {stable_mosaic.version = 11 : i64} {
  func.func @_decoder_kernel(%arg0: memref<4x2xf32, #tpu.memory_space<vmem>>, %arg1: memref<272x128xf32, #tpu.memory_space<vmem>>, %arg2: memref<16x4xf32, #tpu.memory_space<vmem>>) attributes {dimension_semantics = [], scalar_prefetch = 0 : i64, scratch_operands = 0 : i64, tpu.core_type = #tpu.core_type<tc>} {
    %c8 = arith.constant 8 : index
    %c0 = arith.constant 0 : index
    %0 = vector.load %arg1[%c8, %c0] : memref<272x128xf32, #tpu.memory_space<vmem>>, vector<32x128xf32>
    %c265 = arith.constant 265 : index
    %c0_0 = arith.constant 0 : index
    %1 = vector.load %arg1[%c265, %c0_0] : memref<272x128xf32, #tpu.memory_space<vmem>>, vector<1x128xf32>
    %c40 = arith.constant 40 : index
    %c0_1 = arith.constant 0 : index
    %2 = vector.load %arg1[%c40, %c0_1] : memref<272x128xf32, #tpu.memory_space<vmem>>, vector<32x128xf32>
    %c266 = arith.constant 266 : index
    %c0_2 = arith.constant 0 : index
    %3 = vector.load %arg1[%c266, %c0_2] : memref<272x128xf32, #tpu.memory_space<vmem>>, vector<1x128xf32>
    %c0_3 = arith.constant 0 : index
    %c0_4 = arith.constant 0 : index
    %4 = vector.load %arg0[%c0_3, %c0_4] : memref<4x2xf32, #tpu.memory_space<vmem>>, vector<4x2xf32>
    %c0_5 = arith.constant 0 : index
    %c0_6 = arith.constant 0 : index
    %5 = vector.load %arg1[%c0_5, %c0_6] : memref<272x128xf32, #tpu.memory_space<vmem>>, vector<2x128xf32>
    %cst = arith.constant dense<0.000000e+00> : vector<4x128xf32>
    %6 = tpu.matmul %4, %5, %cst {dimension_numbers = #tpu.dot_dimension_numbers<[1], [0], [0], [1], [0, 0, 1, 1], [], []>} : vector<4x2xf32>, vector<2x128xf32>, vector<4x128xf32> -> vector<4x128xf32>
    %c264 = arith.constant 264 : index
    %c0_7 = arith.constant 0 : index
    %7 = vector.load %arg1[%c264, %c0_7] : memref<272x128xf32, #tpu.memory_space<vmem>>, vector<1x128xf32>
    %8 = vector.broadcast %7 : vector<1x128xf32> to vector<4x128xf32>
    %9 = arith.addf %6, %8 : vector<4x128xf32>
    %10 = vector.extract_strided_slice %9 {offsets = [0, 0], sizes = [4, 32], strides = [1, 1]} : vector<4x128xf32> to vector<4x32xf32>
    %11 = arith.negf %10 : vector<4x32xf32>
    %12 = math.exp %11 : vector<4x32xf32>
    %cst_8 = arith.constant 1.000000e+00 : f32
    %13 = vector.broadcast %cst_8 : f32 to vector<4x32xf32>
    %14 = arith.addf %13, %12 : vector<4x32xf32>
    %15 = arith.divf %13, %14 : vector<4x32xf32>
    %16 = vector.extract_strided_slice %9 {offsets = [0, 64], sizes = [4, 32], strides = [1, 1]} : vector<4x128xf32> to vector<4x32xf32>
    %17 = math.tanh %16 : vector<4x32xf32>
    %18 = vector.extract_strided_slice %9 {offsets = [0, 96], sizes = [4, 32], strides = [1, 1]} : vector<4x128xf32> to vector<4x32xf32>
    %19 = arith.negf %18 : vector<4x32xf32>
    %20 = math.exp %19 : vector<4x32xf32>
    %cst_9 = arith.constant 1.000000e+00 : f32
    %21 = vector.broadcast %cst_9 : f32 to vector<4x32xf32>
    %22 = arith.addf %21, %20 : vector<4x32xf32>
    %23 = arith.divf %21, %22 : vector<4x32xf32>
    %24 = arith.mulf %15, %17 : vector<4x32xf32>
    %25 = math.tanh %24 : vector<4x32xf32>
    %26 = arith.mulf %23, %25 : vector<4x32xf32>
    %cst_10 = arith.constant dense<0.000000e+00> : vector<4x128xf32>
    %27 = tpu.matmul %26, %2, %cst_10 {dimension_numbers = #tpu.dot_dimension_numbers<[1], [0], [0], [1], [0, 0, 1, 1], [], []>} : vector<4x32xf32>, vector<32x128xf32>, vector<4x128xf32> -> vector<4x128xf32>
    %28 = vector.broadcast %3 : vector<1x128xf32> to vector<4x128xf32>
    %29 = arith.addf %27, %28 : vector<4x128xf32>
    %30 = vector.extract_strided_slice %29 {offsets = [0, 0], sizes = [4, 32], strides = [1, 1]} : vector<4x128xf32> to vector<4x32xf32>
    %31 = arith.negf %30 : vector<4x32xf32>
    %32 = math.exp %31 : vector<4x32xf32>
    %cst_11 = arith.constant 1.000000e+00 : f32
    %33 = vector.broadcast %cst_11 : f32 to vector<4x32xf32>
    %34 = arith.addf %33, %32 : vector<4x32xf32>
    %35 = arith.divf %33, %34 : vector<4x32xf32>
    %36 = vector.extract_strided_slice %29 {offsets = [0, 64], sizes = [4, 32], strides = [1, 1]} : vector<4x128xf32> to vector<4x32xf32>
    %37 = math.tanh %36 : vector<4x32xf32>
    %38 = vector.extract_strided_slice %29 {offsets = [0, 96], sizes = [4, 32], strides = [1, 1]} : vector<4x128xf32> to vector<4x32xf32>
    %39 = arith.negf %38 : vector<4x32xf32>
    %40 = math.exp %39 : vector<4x32xf32>
    %cst_12 = arith.constant 1.000000e+00 : f32
    %41 = vector.broadcast %cst_12 : f32 to vector<4x32xf32>
    %42 = arith.addf %41, %40 : vector<4x32xf32>
    %43 = arith.divf %41, %42 : vector<4x32xf32>
    %44 = arith.mulf %35, %37 : vector<4x32xf32>
    %45 = math.tanh %44 : vector<4x32xf32>
    %46 = arith.mulf %43, %45 : vector<4x32xf32>
    %47 = vector.extract_strided_slice %46 {offsets = [0, 0], sizes = [2, 32], strides = [1, 1]} : vector<4x32xf32> to vector<2x32xf32>
    %48 = vector.extract_strided_slice %46 {offsets = [2, 0], sizes = [2, 32], strides = [1, 1]} : vector<4x32xf32> to vector<2x32xf32>
    %cst_13 = arith.constant dense<0.000000e+00> : vector<4x128xf32>
    %49 = tpu.matmul %46, %0, %cst_13 {dimension_numbers = #tpu.dot_dimension_numbers<[1], [0], [0], [1], [0, 0, 1, 1], [], []>} : vector<4x32xf32>, vector<32x128xf32>, vector<4x128xf32> -> vector<4x128xf32>
    %50 = vector.broadcast %1 : vector<1x128xf32> to vector<4x128xf32>
    %51 = arith.addf %49, %50 : vector<4x128xf32>
    %52 = vector.extract_strided_slice %51 {offsets = [0, 0], sizes = [4, 32], strides = [1, 1]} : vector<4x128xf32> to vector<4x32xf32>
    %53 = arith.negf %52 : vector<4x32xf32>
    %54 = math.exp %53 : vector<4x32xf32>
    %cst_14 = arith.constant 1.000000e+00 : f32
    %55 = vector.broadcast %cst_14 : f32 to vector<4x32xf32>
    %56 = arith.addf %55, %54 : vector<4x32xf32>
    %57 = arith.divf %55, %56 : vector<4x32xf32>
    %58 = vector.extract_strided_slice %51 {offsets = [0, 64], sizes = [4, 32], strides = [1, 1]} : vector<4x128xf32> to vector<4x32xf32>
    %59 = math.tanh %58 : vector<4x32xf32>
    %60 = vector.extract_strided_slice %51 {offsets = [0, 96], sizes = [4, 32], strides = [1, 1]} : vector<4x128xf32> to vector<4x32xf32>
    %61 = arith.negf %60 : vector<4x32xf32>
    %62 = math.exp %61 : vector<4x32xf32>
    %cst_15 = arith.constant 1.000000e+00 : f32
    %63 = vector.broadcast %cst_15 : f32 to vector<4x32xf32>
    %64 = arith.addf %63, %62 : vector<4x32xf32>
    %65 = arith.divf %63, %64 : vector<4x32xf32>
    %66 = arith.mulf %57, %59 : vector<4x32xf32>
    %67 = math.tanh %66 : vector<4x32xf32>
    %68 = arith.mulf %65, %67 : vector<4x32xf32>
    %cst_16 = arith.constant dense<0.000000e+00> : vector<4x128xf32>
    %69 = tpu.matmul %68, %2, %cst_16 {dimension_numbers = #tpu.dot_dimension_numbers<[1], [0], [0], [1], [0, 0, 1, 1], [], []>} : vector<4x32xf32>, vector<32x128xf32>, vector<4x128xf32> -> vector<4x128xf32>
    %70 = vector.broadcast %3 : vector<1x128xf32> to vector<4x128xf32>
    %71 = arith.addf %69, %70 : vector<4x128xf32>
    %72 = vector.extract_strided_slice %71 {offsets = [0, 0], sizes = [4, 32], strides = [1, 1]} : vector<4x128xf32> to vector<4x32xf32>
    %73 = arith.negf %72 : vector<4x32xf32>
    %74 = math.exp %73 : vector<4x32xf32>
    %cst_17 = arith.constant 1.000000e+00 : f32
    %75 = vector.broadcast %cst_17 : f32 to vector<4x32xf32>
    %76 = arith.addf %75, %74 : vector<4x32xf32>
    %77 = arith.divf %75, %76 : vector<4x32xf32>
    %78 = vector.extract_strided_slice %71 {offsets = [0, 64], sizes = [4, 32], strides = [1, 1]} : vector<4x128xf32> to vector<4x32xf32>
    %79 = math.tanh %78 : vector<4x32xf32>
    %80 = vector.extract_strided_slice %71 {offsets = [0, 96], sizes = [4, 32], strides = [1, 1]} : vector<4x128xf32> to vector<4x32xf32>
    %81 = arith.negf %80 : vector<4x32xf32>
    %82 = math.exp %81 : vector<4x32xf32>
    %cst_18 = arith.constant 1.000000e+00 : f32
    %83 = vector.broadcast %cst_18 : f32 to vector<4x32xf32>
    %84 = arith.addf %83, %82 : vector<4x32xf32>
    %85 = arith.divf %83, %84 : vector<4x32xf32>
    %86 = arith.mulf %77, %79 : vector<4x32xf32>
    %87 = math.tanh %86 : vector<4x32xf32>
    %88 = arith.mulf %85, %87 : vector<4x32xf32>
    %89 = vector.extract_strided_slice %88 {offsets = [0, 0], sizes = [2, 32], strides = [1, 1]} : vector<4x32xf32> to vector<2x32xf32>
    %90 = vector.extract_strided_slice %88 {offsets = [2, 0], sizes = [2, 32], strides = [1, 1]} : vector<4x32xf32> to vector<2x32xf32>
    %cst_19 = arith.constant dense<0.000000e+00> : vector<4x128xf32>
    %91 = tpu.matmul %88, %0, %cst_19 {dimension_numbers = #tpu.dot_dimension_numbers<[1], [0], [0], [1], [0, 0, 1, 1], [], []>} : vector<4x32xf32>, vector<32x128xf32>, vector<4x128xf32> -> vector<4x128xf32>
    %92 = vector.broadcast %1 : vector<1x128xf32> to vector<4x128xf32>
    %93 = arith.addf %91, %92 : vector<4x128xf32>
    %94 = vector.extract_strided_slice %93 {offsets = [0, 0], sizes = [4, 32], strides = [1, 1]} : vector<4x128xf32> to vector<4x32xf32>
    %95 = arith.negf %94 : vector<4x32xf32>
    %96 = math.exp %95 : vector<4x32xf32>
    %cst_20 = arith.constant 1.000000e+00 : f32
    %97 = vector.broadcast %cst_20 : f32 to vector<4x32xf32>
    %98 = arith.addf %97, %96 : vector<4x32xf32>
    %99 = arith.divf %97, %98 : vector<4x32xf32>
    %100 = vector.extract_strided_slice %93 {offsets = [0, 64], sizes = [4, 32], strides = [1, 1]} : vector<4x128xf32> to vector<4x32xf32>
    %101 = math.tanh %100 : vector<4x32xf32>
    %102 = vector.extract_strided_slice %93 {offsets = [0, 96], sizes = [4, 32], strides = [1, 1]} : vector<4x128xf32> to vector<4x32xf32>
    %103 = arith.negf %102 : vector<4x32xf32>
    %104 = math.exp %103 : vector<4x32xf32>
    %cst_21 = arith.constant 1.000000e+00 : f32
    %105 = vector.broadcast %cst_21 : f32 to vector<4x32xf32>
    %106 = arith.addf %105, %104 : vector<4x32xf32>
    %107 = arith.divf %105, %106 : vector<4x32xf32>
    %108 = arith.mulf %99, %101 : vector<4x32xf32>
    %109 = math.tanh %108 : vector<4x32xf32>
    %110 = arith.mulf %107, %109 : vector<4x32xf32>
    %cst_22 = arith.constant dense<0.000000e+00> : vector<4x128xf32>
    %111 = tpu.matmul %110, %2, %cst_22 {dimension_numbers = #tpu.dot_dimension_numbers<[1], [0], [0], [1], [0, 0, 1, 1], [], []>} : vector<4x32xf32>, vector<32x128xf32>, vector<4x128xf32> -> vector<4x128xf32>
    %112 = vector.broadcast %3 : vector<1x128xf32> to vector<4x128xf32>
    %113 = arith.addf %111, %112 : vector<4x128xf32>
    %114 = vector.extract_strided_slice %113 {offsets = [0, 0], sizes = [4, 32], strides = [1, 1]} : vector<4x128xf32> to vector<4x32xf32>
    %115 = arith.negf %114 : vector<4x32xf32>
    %116 = math.exp %115 : vector<4x32xf32>
    %cst_23 = arith.constant 1.000000e+00 : f32
    %117 = vector.broadcast %cst_23 : f32 to vector<4x32xf32>
    %118 = arith.addf %117, %116 : vector<4x32xf32>
    %119 = arith.divf %117, %118 : vector<4x32xf32>
    %120 = vector.extract_strided_slice %113 {offsets = [0, 64], sizes = [4, 32], strides = [1, 1]} : vector<4x128xf32> to vector<4x32xf32>
    %121 = math.tanh %120 : vector<4x32xf32>
    %122 = vector.extract_strided_slice %113 {offsets = [0, 96], sizes = [4, 32], strides = [1, 1]} : vector<4x128xf32> to vector<4x32xf32>
    %123 = arith.negf %122 : vector<4x32xf32>
    %124 = math.exp %123 : vector<4x32xf32>
    %cst_24 = arith.constant 1.000000e+00 : f32
    %125 = vector.broadcast %cst_24 : f32 to vector<4x32xf32>
    %126 = arith.addf %125, %124 : vector<4x32xf32>
    %127 = arith.divf %125, %126 : vector<4x32xf32>
    %128 = arith.mulf %119, %121 : vector<4x32xf32>
    %129 = math.tanh %128 : vector<4x32xf32>
    %130 = arith.mulf %127, %129 : vector<4x32xf32>
    %131 = vector.extract_strided_slice %130 {offsets = [0, 0], sizes = [2, 32], strides = [1, 1]} : vector<4x32xf32> to vector<2x32xf32>
    %132 = vector.extract_strided_slice %130 {offsets = [2, 0], sizes = [2, 32], strides = [1, 1]} : vector<4x32xf32> to vector<2x32xf32>
    %cst_25 = arith.constant dense<0.000000e+00> : vector<4x128xf32>
    %133 = tpu.matmul %130, %0, %cst_25 {dimension_numbers = #tpu.dot_dimension_numbers<[1], [0], [0], [1], [0, 0, 1, 1], [], []>} : vector<4x32xf32>, vector<32x128xf32>, vector<4x128xf32> -> vector<4x128xf32>
    %134 = vector.broadcast %1 : vector<1x128xf32> to vector<4x128xf32>
    %135 = arith.addf %133, %134 : vector<4x128xf32>
    %136 = vector.extract_strided_slice %135 {offsets = [0, 0], sizes = [4, 32], strides = [1, 1]} : vector<4x128xf32> to vector<4x32xf32>
    %137 = arith.negf %136 : vector<4x32xf32>
    %138 = math.exp %137 : vector<4x32xf32>
    %cst_26 = arith.constant 1.000000e+00 : f32
    %139 = vector.broadcast %cst_26 : f32 to vector<4x32xf32>
    %140 = arith.addf %139, %138 : vector<4x32xf32>
    %141 = arith.divf %139, %140 : vector<4x32xf32>
    %142 = vector.extract_strided_slice %135 {offsets = [0, 64], sizes = [4, 32], strides = [1, 1]} : vector<4x128xf32> to vector<4x32xf32>
    %143 = math.tanh %142 : vector<4x32xf32>
    %144 = vector.extract_strided_slice %135 {offsets = [0, 96], sizes = [4, 32], strides = [1, 1]} : vector<4x128xf32> to vector<4x32xf32>
    %145 = arith.negf %144 : vector<4x32xf32>
    %146 = math.exp %145 : vector<4x32xf32>
    %cst_27 = arith.constant 1.000000e+00 : f32
    %147 = vector.broadcast %cst_27 : f32 to vector<4x32xf32>
    %148 = arith.addf %147, %146 : vector<4x32xf32>
    %149 = arith.divf %147, %148 : vector<4x32xf32>
    %150 = arith.mulf %141, %143 : vector<4x32xf32>
    %151 = math.tanh %150 : vector<4x32xf32>
    %152 = arith.mulf %149, %151 : vector<4x32xf32>
    %cst_28 = arith.constant dense<0.000000e+00> : vector<4x128xf32>
    %153 = tpu.matmul %152, %2, %cst_28 {dimension_numbers = #tpu.dot_dimension_numbers<[1], [0], [0], [1], [0, 0, 1, 1], [], []>} : vector<4x32xf32>, vector<32x128xf32>, vector<4x128xf32> -> vector<4x128xf32>
    %154 = vector.broadcast %3 : vector<1x128xf32> to vector<4x128xf32>
    %155 = arith.addf %153, %154 : vector<4x128xf32>
    %156 = vector.extract_strided_slice %155 {offsets = [0, 0], sizes = [4, 32], strides = [1, 1]} : vector<4x128xf32> to vector<4x32xf32>
    %157 = arith.negf %156 : vector<4x32xf32>
    %158 = math.exp %157 : vector<4x32xf32>
    %cst_29 = arith.constant 1.000000e+00 : f32
    %159 = vector.broadcast %cst_29 : f32 to vector<4x32xf32>
    %160 = arith.addf %159, %158 : vector<4x32xf32>
    %161 = arith.divf %159, %160 : vector<4x32xf32>
    %162 = vector.extract_strided_slice %155 {offsets = [0, 64], sizes = [4, 32], strides = [1, 1]} : vector<4x128xf32> to vector<4x32xf32>
    %163 = math.tanh %162 : vector<4x32xf32>
    %164 = vector.extract_strided_slice %155 {offsets = [0, 96], sizes = [4, 32], strides = [1, 1]} : vector<4x128xf32> to vector<4x32xf32>
    %165 = arith.negf %164 : vector<4x32xf32>
    %166 = math.exp %165 : vector<4x32xf32>
    %cst_30 = arith.constant 1.000000e+00 : f32
    %167 = vector.broadcast %cst_30 : f32 to vector<4x32xf32>
    %168 = arith.addf %167, %166 : vector<4x32xf32>
    %169 = arith.divf %167, %168 : vector<4x32xf32>
    %170 = arith.mulf %161, %163 : vector<4x32xf32>
    %171 = math.tanh %170 : vector<4x32xf32>
    %172 = arith.mulf %169, %171 : vector<4x32xf32>
    %173 = vector.extract_strided_slice %172 {offsets = [0, 0], sizes = [2, 32], strides = [1, 1]} : vector<4x32xf32> to vector<2x32xf32>
    %174 = vector.extract_strided_slice %172 {offsets = [2, 0], sizes = [2, 32], strides = [1, 1]} : vector<4x32xf32> to vector<2x32xf32>
    %cst_31 = arith.constant dense<0.000000e+00> : vector<4x128xf32>
    %175 = tpu.matmul %172, %0, %cst_31 {dimension_numbers = #tpu.dot_dimension_numbers<[1], [0], [0], [1], [0, 0, 1, 1], [], []>} : vector<4x32xf32>, vector<32x128xf32>, vector<4x128xf32> -> vector<4x128xf32>
    %176 = vector.broadcast %1 : vector<1x128xf32> to vector<4x128xf32>
    %177 = arith.addf %175, %176 : vector<4x128xf32>
    %178 = vector.extract_strided_slice %177 {offsets = [0, 0], sizes = [4, 32], strides = [1, 1]} : vector<4x128xf32> to vector<4x32xf32>
    %179 = arith.negf %178 : vector<4x32xf32>
    %180 = math.exp %179 : vector<4x32xf32>
    %cst_32 = arith.constant 1.000000e+00 : f32
    %181 = vector.broadcast %cst_32 : f32 to vector<4x32xf32>
    %182 = arith.addf %181, %180 : vector<4x32xf32>
    %183 = arith.divf %181, %182 : vector<4x32xf32>
    %184 = vector.extract_strided_slice %177 {offsets = [0, 64], sizes = [4, 32], strides = [1, 1]} : vector<4x128xf32> to vector<4x32xf32>
    %185 = math.tanh %184 : vector<4x32xf32>
    %186 = vector.extract_strided_slice %177 {offsets = [0, 96], sizes = [4, 32], strides = [1, 1]} : vector<4x128xf32> to vector<4x32xf32>
    %187 = arith.negf %186 : vector<4x32xf32>
    %188 = math.exp %187 : vector<4x32xf32>
    %cst_33 = arith.constant 1.000000e+00 : f32
    %189 = vector.broadcast %cst_33 : f32 to vector<4x32xf32>
    %190 = arith.addf %189, %188 : vector<4x32xf32>
    %191 = arith.divf %189, %190 : vector<4x32xf32>
    %192 = arith.mulf %183, %185 : vector<4x32xf32>
    %193 = math.tanh %192 : vector<4x32xf32>
    %194 = arith.mulf %191, %193 : vector<4x32xf32>
    %cst_34 = arith.constant dense<0.000000e+00> : vector<4x128xf32>
    %195 = tpu.matmul %194, %2, %cst_34 {dimension_numbers = #tpu.dot_dimension_numbers<[1], [0], [0], [1], [0, 0, 1, 1], [], []>} : vector<4x32xf32>, vector<32x128xf32>, vector<4x128xf32> -> vector<4x128xf32>
    %196 = vector.broadcast %3 : vector<1x128xf32> to vector<4x128xf32>
    %197 = arith.addf %195, %196 : vector<4x128xf32>
    %198 = vector.extract_strided_slice %197 {offsets = [0, 0], sizes = [4, 32], strides = [1, 1]} : vector<4x128xf32> to vector<4x32xf32>
    %199 = arith.negf %198 : vector<4x32xf32>
    %200 = math.exp %199 : vector<4x32xf32>
    %cst_35 = arith.constant 1.000000e+00 : f32
    %201 = vector.broadcast %cst_35 : f32 to vector<4x32xf32>
    %202 = arith.addf %201, %200 : vector<4x32xf32>
    %203 = arith.divf %201, %202 : vector<4x32xf32>
    %204 = vector.extract_strided_slice %197 {offsets = [0, 64], sizes = [4, 32], strides = [1, 1]} : vector<4x128xf32> to vector<4x32xf32>
    %205 = math.tanh %204 : vector<4x32xf32>
    %206 = vector.extract_strided_slice %197 {offsets = [0, 96], sizes = [4, 32], strides = [1, 1]} : vector<4x128xf32> to vector<4x32xf32>
    %207 = arith.negf %206 : vector<4x32xf32>
    %208 = math.exp %207 : vector<4x32xf32>
    %cst_36 = arith.constant 1.000000e+00 : f32
    %209 = vector.broadcast %cst_36 : f32 to vector<4x32xf32>
    %210 = arith.addf %209, %208 : vector<4x32xf32>
    %211 = arith.divf %209, %210 : vector<4x32xf32>
    %212 = arith.mulf %203, %205 : vector<4x32xf32>
    %213 = math.tanh %212 : vector<4x32xf32>
    %214 = arith.mulf %211, %213 : vector<4x32xf32>
    %215 = vector.extract_strided_slice %214 {offsets = [0, 0], sizes = [2, 32], strides = [1, 1]} : vector<4x32xf32> to vector<2x32xf32>
    %216 = vector.extract_strided_slice %214 {offsets = [2, 0], sizes = [2, 32], strides = [1, 1]} : vector<4x32xf32> to vector<2x32xf32>
    %cst_37 = arith.constant dense<0.000000e+00> : vector<4x128xf32>
    %217 = tpu.matmul %214, %0, %cst_37 {dimension_numbers = #tpu.dot_dimension_numbers<[1], [0], [0], [1], [0, 0, 1, 1], [], []>} : vector<4x32xf32>, vector<32x128xf32>, vector<4x128xf32> -> vector<4x128xf32>
    %218 = vector.broadcast %1 : vector<1x128xf32> to vector<4x128xf32>
    %219 = arith.addf %217, %218 : vector<4x128xf32>
    %220 = vector.extract_strided_slice %219 {offsets = [0, 0], sizes = [4, 32], strides = [1, 1]} : vector<4x128xf32> to vector<4x32xf32>
    %221 = arith.negf %220 : vector<4x32xf32>
    %222 = math.exp %221 : vector<4x32xf32>
    %cst_38 = arith.constant 1.000000e+00 : f32
    %223 = vector.broadcast %cst_38 : f32 to vector<4x32xf32>
    %224 = arith.addf %223, %222 : vector<4x32xf32>
    %225 = arith.divf %223, %224 : vector<4x32xf32>
    %226 = vector.extract_strided_slice %219 {offsets = [0, 64], sizes = [4, 32], strides = [1, 1]} : vector<4x128xf32> to vector<4x32xf32>
    %227 = math.tanh %226 : vector<4x32xf32>
    %228 = vector.extract_strided_slice %219 {offsets = [0, 96], sizes = [4, 32], strides = [1, 1]} : vector<4x128xf32> to vector<4x32xf32>
    %229 = arith.negf %228 : vector<4x32xf32>
    %230 = math.exp %229 : vector<4x32xf32>
    %cst_39 = arith.constant 1.000000e+00 : f32
    %231 = vector.broadcast %cst_39 : f32 to vector<4x32xf32>
    %232 = arith.addf %231, %230 : vector<4x32xf32>
    %233 = arith.divf %231, %232 : vector<4x32xf32>
    %234 = arith.mulf %225, %227 : vector<4x32xf32>
    %235 = math.tanh %234 : vector<4x32xf32>
    %236 = arith.mulf %233, %235 : vector<4x32xf32>
    %cst_40 = arith.constant dense<0.000000e+00> : vector<4x128xf32>
    %237 = tpu.matmul %236, %2, %cst_40 {dimension_numbers = #tpu.dot_dimension_numbers<[1], [0], [0], [1], [0, 0, 1, 1], [], []>} : vector<4x32xf32>, vector<32x128xf32>, vector<4x128xf32> -> vector<4x128xf32>
    %238 = vector.broadcast %3 : vector<1x128xf32> to vector<4x128xf32>
    %239 = arith.addf %237, %238 : vector<4x128xf32>
    %240 = vector.extract_strided_slice %239 {offsets = [0, 0], sizes = [4, 32], strides = [1, 1]} : vector<4x128xf32> to vector<4x32xf32>
    %241 = arith.negf %240 : vector<4x32xf32>
    %242 = math.exp %241 : vector<4x32xf32>
    %cst_41 = arith.constant 1.000000e+00 : f32
    %243 = vector.broadcast %cst_41 : f32 to vector<4x32xf32>
    %244 = arith.addf %243, %242 : vector<4x32xf32>
    %245 = arith.divf %243, %244 : vector<4x32xf32>
    %246 = vector.extract_strided_slice %239 {offsets = [0, 64], sizes = [4, 32], strides = [1, 1]} : vector<4x128xf32> to vector<4x32xf32>
    %247 = math.tanh %246 : vector<4x32xf32>
    %248 = vector.extract_strided_slice %239 {offsets = [0, 96], sizes = [4, 32], strides = [1, 1]} : vector<4x128xf32> to vector<4x32xf32>
    %249 = arith.negf %248 : vector<4x32xf32>
    %250 = math.exp %249 : vector<4x32xf32>
    %cst_42 = arith.constant 1.000000e+00 : f32
    %251 = vector.broadcast %cst_42 : f32 to vector<4x32xf32>
    %252 = arith.addf %251, %250 : vector<4x32xf32>
    %253 = arith.divf %251, %252 : vector<4x32xf32>
    %254 = arith.mulf %245, %247 : vector<4x32xf32>
    %255 = math.tanh %254 : vector<4x32xf32>
    %256 = arith.mulf %253, %255 : vector<4x32xf32>
    %257 = vector.extract_strided_slice %256 {offsets = [0, 0], sizes = [2, 32], strides = [1, 1]} : vector<4x32xf32> to vector<2x32xf32>
    %258 = vector.extract_strided_slice %256 {offsets = [2, 0], sizes = [2, 32], strides = [1, 1]} : vector<4x32xf32> to vector<2x32xf32>
    %cst_43 = arith.constant dense<0.000000e+00> : vector<4x128xf32>
    %259 = tpu.matmul %256, %0, %cst_43 {dimension_numbers = #tpu.dot_dimension_numbers<[1], [0], [0], [1], [0, 0, 1, 1], [], []>} : vector<4x32xf32>, vector<32x128xf32>, vector<4x128xf32> -> vector<4x128xf32>
    %260 = vector.broadcast %1 : vector<1x128xf32> to vector<4x128xf32>
    %261 = arith.addf %259, %260 : vector<4x128xf32>
    %262 = vector.extract_strided_slice %261 {offsets = [0, 0], sizes = [4, 32], strides = [1, 1]} : vector<4x128xf32> to vector<4x32xf32>
    %263 = arith.negf %262 : vector<4x32xf32>
    %264 = math.exp %263 : vector<4x32xf32>
    %cst_44 = arith.constant 1.000000e+00 : f32
    %265 = vector.broadcast %cst_44 : f32 to vector<4x32xf32>
    %266 = arith.addf %265, %264 : vector<4x32xf32>
    %267 = arith.divf %265, %266 : vector<4x32xf32>
    %268 = vector.extract_strided_slice %261 {offsets = [0, 64], sizes = [4, 32], strides = [1, 1]} : vector<4x128xf32> to vector<4x32xf32>
    %269 = math.tanh %268 : vector<4x32xf32>
    %270 = vector.extract_strided_slice %261 {offsets = [0, 96], sizes = [4, 32], strides = [1, 1]} : vector<4x128xf32> to vector<4x32xf32>
    %271 = arith.negf %270 : vector<4x32xf32>
    %272 = math.exp %271 : vector<4x32xf32>
    %cst_45 = arith.constant 1.000000e+00 : f32
    %273 = vector.broadcast %cst_45 : f32 to vector<4x32xf32>
    %274 = arith.addf %273, %272 : vector<4x32xf32>
    %275 = arith.divf %273, %274 : vector<4x32xf32>
    %276 = arith.mulf %267, %269 : vector<4x32xf32>
    %277 = math.tanh %276 : vector<4x32xf32>
    %278 = arith.mulf %275, %277 : vector<4x32xf32>
    %cst_46 = arith.constant dense<0.000000e+00> : vector<4x128xf32>
    %279 = tpu.matmul %278, %2, %cst_46 {dimension_numbers = #tpu.dot_dimension_numbers<[1], [0], [0], [1], [0, 0, 1, 1], [], []>} : vector<4x32xf32>, vector<32x128xf32>, vector<4x128xf32> -> vector<4x128xf32>
    %280 = vector.broadcast %3 : vector<1x128xf32> to vector<4x128xf32>
    %281 = arith.addf %279, %280 : vector<4x128xf32>
    %282 = vector.extract_strided_slice %281 {offsets = [0, 0], sizes = [4, 32], strides = [1, 1]} : vector<4x128xf32> to vector<4x32xf32>
    %283 = arith.negf %282 : vector<4x32xf32>
    %284 = math.exp %283 : vector<4x32xf32>
    %cst_47 = arith.constant 1.000000e+00 : f32
    %285 = vector.broadcast %cst_47 : f32 to vector<4x32xf32>
    %286 = arith.addf %285, %284 : vector<4x32xf32>
    %287 = arith.divf %285, %286 : vector<4x32xf32>
    %288 = vector.extract_strided_slice %281 {offsets = [0, 64], sizes = [4, 32], strides = [1, 1]} : vector<4x128xf32> to vector<4x32xf32>
    %289 = math.tanh %288 : vector<4x32xf32>
    %290 = vector.extract_strided_slice %281 {offsets = [0, 96], sizes = [4, 32], strides = [1, 1]} : vector<4x128xf32> to vector<4x32xf32>
    %291 = arith.negf %290 : vector<4x32xf32>
    %292 = math.exp %291 : vector<4x32xf32>
    %cst_48 = arith.constant 1.000000e+00 : f32
    %293 = vector.broadcast %cst_48 : f32 to vector<4x32xf32>
    %294 = arith.addf %293, %292 : vector<4x32xf32>
    %295 = arith.divf %293, %294 : vector<4x32xf32>
    %296 = arith.mulf %287, %289 : vector<4x32xf32>
    %297 = math.tanh %296 : vector<4x32xf32>
    %298 = arith.mulf %295, %297 : vector<4x32xf32>
    %299 = vector.extract_strided_slice %298 {offsets = [0, 0], sizes = [2, 32], strides = [1, 1]} : vector<4x32xf32> to vector<2x32xf32>
    %300 = vector.extract_strided_slice %298 {offsets = [2, 0], sizes = [2, 32], strides = [1, 1]} : vector<4x32xf32> to vector<2x32xf32>
    %cst_49 = arith.constant dense<0.000000e+00> : vector<4x128xf32>
    %301 = tpu.matmul %298, %0, %cst_49 {dimension_numbers = #tpu.dot_dimension_numbers<[1], [0], [0], [1], [0, 0, 1, 1], [], []>} : vector<4x32xf32>, vector<32x128xf32>, vector<4x128xf32> -> vector<4x128xf32>
    %302 = vector.broadcast %1 : vector<1x128xf32> to vector<4x128xf32>
    %303 = arith.addf %301, %302 : vector<4x128xf32>
    %304 = vector.extract_strided_slice %303 {offsets = [0, 0], sizes = [4, 32], strides = [1, 1]} : vector<4x128xf32> to vector<4x32xf32>
    %305 = arith.negf %304 : vector<4x32xf32>
    %306 = math.exp %305 : vector<4x32xf32>
    %cst_50 = arith.constant 1.000000e+00 : f32
    %307 = vector.broadcast %cst_50 : f32 to vector<4x32xf32>
    %308 = arith.addf %307, %306 : vector<4x32xf32>
    %309 = arith.divf %307, %308 : vector<4x32xf32>
    %310 = vector.extract_strided_slice %303 {offsets = [0, 64], sizes = [4, 32], strides = [1, 1]} : vector<4x128xf32> to vector<4x32xf32>
    %311 = math.tanh %310 : vector<4x32xf32>
    %312 = vector.extract_strided_slice %303 {offsets = [0, 96], sizes = [4, 32], strides = [1, 1]} : vector<4x128xf32> to vector<4x32xf32>
    %313 = arith.negf %312 : vector<4x32xf32>
    %314 = math.exp %313 : vector<4x32xf32>
    %cst_51 = arith.constant 1.000000e+00 : f32
    %315 = vector.broadcast %cst_51 : f32 to vector<4x32xf32>
    %316 = arith.addf %315, %314 : vector<4x32xf32>
    %317 = arith.divf %315, %316 : vector<4x32xf32>
    %318 = arith.mulf %309, %311 : vector<4x32xf32>
    %319 = math.tanh %318 : vector<4x32xf32>
    %320 = arith.mulf %317, %319 : vector<4x32xf32>
    %cst_52 = arith.constant dense<0.000000e+00> : vector<4x128xf32>
    %321 = tpu.matmul %320, %2, %cst_52 {dimension_numbers = #tpu.dot_dimension_numbers<[1], [0], [0], [1], [0, 0, 1, 1], [], []>} : vector<4x32xf32>, vector<32x128xf32>, vector<4x128xf32> -> vector<4x128xf32>
    %322 = vector.broadcast %3 : vector<1x128xf32> to vector<4x128xf32>
    %323 = arith.addf %321, %322 : vector<4x128xf32>
    %324 = vector.extract_strided_slice %323 {offsets = [0, 0], sizes = [4, 32], strides = [1, 1]} : vector<4x128xf32> to vector<4x32xf32>
    %325 = arith.negf %324 : vector<4x32xf32>
    %326 = math.exp %325 : vector<4x32xf32>
    %cst_53 = arith.constant 1.000000e+00 : f32
    %327 = vector.broadcast %cst_53 : f32 to vector<4x32xf32>
    %328 = arith.addf %327, %326 : vector<4x32xf32>
    %329 = arith.divf %327, %328 : vector<4x32xf32>
    %330 = vector.extract_strided_slice %323 {offsets = [0, 64], sizes = [4, 32], strides = [1, 1]} : vector<4x128xf32> to vector<4x32xf32>
    %331 = math.tanh %330 : vector<4x32xf32>
    %332 = vector.extract_strided_slice %323 {offsets = [0, 96], sizes = [4, 32], strides = [1, 1]} : vector<4x128xf32> to vector<4x32xf32>
    %333 = arith.negf %332 : vector<4x32xf32>
    %334 = math.exp %333 : vector<4x32xf32>
    %cst_54 = arith.constant 1.000000e+00 : f32
    %335 = vector.broadcast %cst_54 : f32 to vector<4x32xf32>
    %336 = arith.addf %335, %334 : vector<4x32xf32>
    %337 = arith.divf %335, %336 : vector<4x32xf32>
    %338 = arith.mulf %329, %331 : vector<4x32xf32>
    %339 = math.tanh %338 : vector<4x32xf32>
    %340 = arith.mulf %337, %339 : vector<4x32xf32>
    %341 = vector.extract_strided_slice %340 {offsets = [0, 0], sizes = [2, 32], strides = [1, 1]} : vector<4x32xf32> to vector<2x32xf32>
    %342 = vector.extract_strided_slice %340 {offsets = [2, 0], sizes = [2, 32], strides = [1, 1]} : vector<4x32xf32> to vector<2x32xf32>
    %343 = tpu.concatenate %47, %89, %131, %173, %215, %257, %299, %341 in 0 : vector<2x32xf32>, vector<2x32xf32>, vector<2x32xf32>, vector<2x32xf32>, vector<2x32xf32>, vector<2x32xf32>, vector<2x32xf32>, vector<2x32xf32> -> vector<16x32xf32>
    %344 = tpu.concatenate %48, %90, %132, %174, %216, %258, %300, %342 in 0 : vector<2x32xf32>, vector<2x32xf32>, vector<2x32xf32>, vector<2x32xf32>, vector<2x32xf32>, vector<2x32xf32>, vector<2x32xf32>, vector<2x32xf32> -> vector<16x32xf32>
    %345 = tpu.concatenate %343, %344 in 1 : vector<16x32xf32>, vector<16x32xf32> -> vector<16x64xf32>
    %c72 = arith.constant 72 : index
    %c0_55 = arith.constant 0 : index
    %346 = vector.load %arg1[%c72, %c0_55] : memref<272x128xf32, #tpu.memory_space<vmem>>, vector<64x128xf32>
    %cst_56 = arith.constant dense<0.000000e+00> : vector<16x128xf32>
    %347 = tpu.matmul %345, %346, %cst_56 {dimension_numbers = #tpu.dot_dimension_numbers<[1], [0], [0], [1], [0, 0, 1, 1], [], []>} : vector<16x64xf32>, vector<64x128xf32>, vector<16x128xf32> -> vector<16x128xf32>
    %c267 = arith.constant 267 : index
    %c0_57 = arith.constant 0 : index
    %348 = vector.load %arg1[%c267, %c0_57] : memref<272x128xf32, #tpu.memory_space<vmem>>, vector<1x128xf32>
    %349 = vector.broadcast %348 : vector<1x128xf32> to vector<16x128xf32>
    %350 = arith.addf %347, %349 : vector<16x128xf32>
    %cst_58 = arith.constant 0.000000e+00 : f32
    %351 = vector.broadcast %cst_58 : f32 to vector<16x128xf32>
    %352 = arith.maximumf %350, %351 : vector<16x128xf32>
    %c136 = arith.constant 136 : index
    %c0_59 = arith.constant 0 : index
    %353 = vector.load %arg1[%c136, %c0_59] : memref<272x128xf32, #tpu.memory_space<vmem>>, vector<128x4xf32>
    %cst_60 = arith.constant dense<0.000000e+00> : vector<16x4xf32>
    %354 = tpu.matmul %352, %353, %cst_60 {dimension_numbers = #tpu.dot_dimension_numbers<[1], [0], [0], [1], [0, 0, 1, 1], [], []>} : vector<16x128xf32>, vector<128x4xf32>, vector<16x4xf32> -> vector<16x4xf32>
    %c268 = arith.constant 268 : index
    %c0_61 = arith.constant 0 : index
    %355 = vector.load %arg1[%c268, %c0_61] : memref<272x128xf32, #tpu.memory_space<vmem>>, vector<1x4xf32>
    %356 = vector.broadcast %355 : vector<1x4xf32> to vector<16x4xf32>
    %357 = arith.addf %354, %356 : vector<16x4xf32>
    %c0_62 = arith.constant 0 : index
    %c0_63 = arith.constant 0 : index
    %358 = vector.load %arg2[%c0_62, %c0_63] : memref<16x4xf32, #tpu.memory_space<vmem>>, vector<16x4xf32>
    tpu.vector_store %arg2[%c0_62, %c0_63], %357 {strides = array<i32>} : memref<16x4xf32, #tpu.memory_space<vmem>>, vector<16x4xf32>,
    return
  }
}

</mosaic_0001>

<bundles_post_ra>
// kernel: decoder_forward.1
= control target key start
LH: loop header
LB: loop body
LE: loop exit
PB: predicated region body
PF: predicated region fallthrough
CT: control target
= control target key end

     0   :  { %7 = vsyncpa [#allocation3], 0  ;;  %s1292_s12 = smov [#allocation2]   ;;  %s1293_s14 = smov 128   ;;  %s1540_s0 = inlined_call_operand.vmem [shape: f32[4,2], index: 0, kind: input, shape index: {}]   ;;  %s1541_s1 = inlined_call_operand.hbm [shape: f32[272,128], index: 1, kind: input, shape index: {}]   ;;  %s1542_s2 = inlined_call_operand.vmem [shape: f32[16,4], index: 2, kind: output, shape index: {}]  }
   0x1   :  { %s14_s11 = sshll.u32 %s1541_s1, 4  ;;  %s16_s13 = sshll.u32 %s1292_s12, 4  ;;  %s15_s11 = int_to_ptr.hbm [resolvable:$true] %s14_s11  ;;  %s17_s13 = int_to_ptr.vmem [resolvable:$true] %s16_s13 }
   0x2   :  { %s1294_s15 = smov 8  }
   0x3   :  { %22 = dma.hbm_to_vmem [thread:$0]  %s15_s11, 4352, %s17_s13, [#allocation3], %s1293_s14, %s1293_s14, %s1294_s15  }
   0x4   :  { %1290 = dma.done.wait [#allocation3], 4352  }
   0x5   :  { %1291 = vsyncadd [#allocation3], 4294962944  ;;  %vm45_vm0 = vcmask 1041408   ;;  %vm41_vm1 = vcmask 15360   ;;  %v38_v0 = vld [vmem:[#allocation2] sm:$0x3] }
   0x6   :  { %v37_v1 = vld [vmem:[%s1540_s0] sm:$0xf]  ;;  %1091 = vmatpush.msk.msra.mxu3 %vm45_vm0, %v38_v0  ;;  %v1132_v2 = vld [vmem:[#allocation2 + $0x108] ss:$0 sm:$0xff]  ;;  %s1295_s1 = smov 64   ;;  %s1296_s0 = smov 96  }
   0x7   :  { %1092 = vmatmul.msk.f32.vlgmr.msra.gmra.mxu3 %vm41_vm1, %v37_v1  ;;  %v1322_v22 = vld [vmem:[#allocation2 + $0x40] sm:$0xff]  ;;  %v1324_v23 = vld [vmem:[#allocation2 + $0x38] sm:$0xff]  ;;  %v1328_v24 = vld [vmem:[#allocation2 + $0x30] sm:$0xff]  ;;  %s1297_s18 = smov 32   ;;  %vm104_vm6 = vcmask 261120  }
   0x8   :  { %119 = vmatpush.msra.mxu2 %v1322_v22  ;;  %232 = vmatpush.msrb.mxu3 %v1322_v22  ;;  %v1338_v27 = vld [vmem:[#allocation2 + $0x28] sm:$0xff]  ;;  %v1353_v49 = vld [vmem:[#allocation2 + $0x20] sm:$0xff]  ;;  %v1355_v50 = vld [vmem:[#allocation2 + $0x18] sm:$0xff] }
   0x9   :  { %792 = vmatpush.msra.mxu1 %v1322_v22  ;;  %v1348_v29 = vld [vmem:[#allocation2 + $0x10a] ss:$0 sm:$0xff]  ;;  %288 = vmatpush.msra.mxu0 %v1353_v49  ;;  %v1359_v51 = vld [vmem:[#allocation2 + $0x10] sm:$0xff]  ;;  %v1386_v56 = vld [vmem:[#allocation2 + $0x109] ss:$0 sm:$0xff] }
   0xa   :  { %120 = vmatpush.msra.mxu2 %v1324_v23  ;;  %233 = vmatpush.msrb.mxu3 %v1324_v23  ;;  %v1363_v52 = vld [vmem:[#allocation2 + $0x8] sm:$0xff] }
   0xb   :  { %793 = vmatpush.msra.mxu1 %v1324_v23  ;;  %289 = vmatpush.msra.mxu0 %v1355_v50 }
   0xc   :  { %121 = vmatpush.msra.mxu2 %v1328_v24  ;;  %234 = vmatpush.msrb.mxu3 %v1328_v24 }
   0xd   :  { %794 = vmatpush.msra.mxu1 %v1328_v24  ;;  %290 = vmatpush.msra.mxu0 %v1359_v51 }
   0xe   :  { %122 = vmatpush.msra.mxu2 %v1338_v27  ;;  %235 = vmatpush.msrb.mxu3 %v1338_v27 }
   0xf   :  { %795 = vmatpush.msra.mxu1 %v1338_v27  ;;  %291 = vmatpush.msra.mxu0 %v1363_v52 }
  0x10   :  { %344 = vmatpush.msra.mxu3 %v1322_v22  ;;  %176 = vmatpush.msrb.mxu2 %v1353_v49 }
  0x11   :  { %512 = vmatpush.msrb.mxu0 %v1353_v49 }
  0x12   :  { %345 = vmatpush.msra.mxu3 %v1324_v23  ;;  %177 = vmatpush.msrb.mxu2 %v1355_v50 }
  0x13   :  { %513 = vmatpush.msrb.mxu0 %v1355_v50 }
  0x14   :  { %346 = vmatpush.msra.mxu3 %v1328_v24  ;;  %178 = vmatpush.msrb.mxu2 %v1359_v51 }
  0x15   :  { %514 = vmatpush.msrb.mxu0 %v1359_v51 }
  0x16   :  { %347 = vmatpush.msra.mxu3 %v1338_v27  ;;  %179 = vmatpush.msrb.mxu2 %v1363_v52 }
  0x17   :  { %515 = vmatpush.msrb.mxu0 %v1363_v52 }
  0x8a   :  { %v66_v3 = vpop.f32.mrf.mxu3 }
  0x8b   :  { %v67_v4 = vadd.f32 %v1132_v2, %v66_v3 }
  0x8d   :  { %1137 = vtanh.f32 %v67_v4  ;;  %v1093_v6 = vmul.f32 -1.442695, %v67_v4 }
  0x8f   :  { %1139 = vpow2.f32 %v1093_v6 }
  0x93   :  { %v1138_v5 = vpop.eup %1137 }
  0x94   :  { %90 = vrot.lane.b32.xlu0 %v1138_v5, %s1295_s1 }
  0x95   :  { %v1140_v7 = vpop.eup %1139 }
  0x96   :  { %v72_v8 = vadd.f32 1.0, %v1140_v7 }
  0x98   :  { %1141 = vrcp.f32 %v72_v8  ;;  %v84_v14 = vand.u32 2147483648, %v72_v8  ;;  %vm78_vm3 = vweird.f32 %v72_v8  ;;  %v82_v15 = vand.u32 2147483647, %v72_v8 }
  0x9a   :  { %v85_v17 = vor.u32 1.1754944e-38, %v84_v14  ;;  %vm83_vm5 = vcmp.eq.f32.partialorder %v82_v15, 8.507059e+37 }
  0x9e   :  { %v1142_v9 = vpop.eup %1141 }
  0x9f   :  { %v74_v10 = vmul.f32 %v1142_v9, %v72_v8  ;;  %vm79_vm2 = vweird.f32 %v1142_v9 }
  0xa0   :  { %vm80_vm4 = vmor %vm78_vm3, %vm79_vm2 }
  0xa1   :  { %v75_v11 = vsub.f32 1.0, %v74_v10 }
  0xa3   :  { %v76_v12 = vmul.f32 %v1142_v9, %v75_v11 }
  0xa5   :  { %v77_v13 = vadd.f32 %v1142_v9, %v76_v12 }
  0xa7   :  { %v81_v16 = vsel %vm80_vm4, %v1142_v9, %v77_v13 }
  0xa8   :  { %v86_v19 = vsel %vm83_vm5, %v85_v17, %v81_v16 }
 0x106   :  { %v91_v18 = vpop.permute.xlu0 %90 }
 0x107   :  { %v93_v20 = vmul.f32 %v91_v18, %v86_v19 }
 0x109   :  { %1143 = vtanh.f32 %v93_v20 }
 0x10f   :  { %v1144_v21 = vpop.eup %1143 }
 0x110   :  { %96 = vrot.lane.b32.xlu0 %v1144_v21, %s1296_s0 }
 0x182   :  { %v97_v25 = vpop.permute.xlu0 %96 }
 0x183   :  { %v99_v26 = vmul.f32 %v97_v25, %v86_v19 }
 0x185   :  { %102 = vrot.lane.b32.xlu1 %v99_v26, %s1297_s18 }
 0x1f7   :  { %v103_v28 = vpop.permute.xlu1 %102 }
 0x1f8   :  { %1094 = vmatmul.msk.f32.vlgmr.msra.gmra.mxu2 %vm104_vm6, %v103_v28 }
 0x1f9   :  { %400 = vmatpush.msra.mxu2 %v1353_v49 }
 0x1fb   :  { %401 = vmatpush.msra.mxu2 %v1355_v50 }
 0x1fd   :  { %402 = vmatpush.msra.mxu2 %v1359_v51 }
 0x1ff   :  { %403 = vmatpush.msra.mxu2 %v1363_v52 }
 0x27b   :  { %v124_v30 = vpop.f32.mrf.mxu2 }
 0x27c   :  { %v125_v31 = vadd.f32 %v1348_v29, %v124_v30 }
 0x27e   :  { %1145 = vtanh.f32 %v125_v31  ;;  %v1095_v33 = vmul.f32 -1.442695, %v125_v31 }
 0x280   :  { %1147 = vpow2.f32 %v1095_v33 }
 0x284   :  { %v1146_v32 = vpop.eup %1145 }
 0x285   :  { %148 = vrot.lane.b32.xlu1 %v1146_v32, %s1295_s1 }
 0x286   :  { %v1148_v34 = vpop.eup %1147 }
 0x287   :  { %v130_v35 = vadd.f32 1.0, %v1148_v34 }
 0x289   :  { %1149 = vrcp.f32 %v130_v35  ;;  %v142_v41 = vand.u32 2147483648, %v130_v35  ;;  %vm136_vm8 = vweird.f32 %v130_v35  ;;  %v140_v42 = vand.u32 2147483647, %v130_v35 }
 0x28b   :  { %v143_v44 = vor.u32 1.1754944e-38, %v142_v41  ;;  %vm141_vm10 = vcmp.eq.f32.partialorder %v140_v42, 8.507059e+37 }
 0x28f   :  { %v1150_v36 = vpop.eup %1149 }
 0x290   :  { %v132_v37 = vmul.f32 %v1150_v36, %v130_v35  ;;  %vm137_vm7 = vweird.f32 %v1150_v36 }
 0x291   :  { %vm138_vm9 = vmor %vm136_vm8, %vm137_vm7 }
 0x292   :  { %v133_v38 = vsub.f32 1.0, %v132_v37 }
 0x294   :  { %v134_v39 = vmul.f32 %v1150_v36, %v133_v38 }
 0x296   :  { %v135_v40 = vadd.f32 %v1150_v36, %v134_v39 }
 0x298   :  { %v139_v43 = vsel %vm138_vm9, %v1150_v36, %v135_v40 }
 0x299   :  { %v144_v46 = vsel %vm141_vm10, %v143_v44, %v139_v43 }
 0x2f7   :  { %v149_v45 = vpop.permute.xlu1 %148 }
 0x2f8   :  { %v151_v47 = vmul.f32 %v149_v45, %v144_v46 }
 0x2fa   :  { %1151 = vtanh.f32 %v151_v47 }
 0x300   :  { %v1152_v48 = vpop.eup %1151 }
 0x301   :  { %154 = vrot.lane.b32.xlu2 %v1152_v48, %s1296_s0 }
 0x35b   :  { %v155_v53 = vpop.permute.xlu2 %154 }
 0x35c   :  { %v1377_v54 = vmul.f32 %v155_v53, %v144_v46 }
 0x35e   :  { %160 = vrot.lane.b32.xlu2 %v1377_v54, %s1297_s18 }
 0x3b8   :  { %v161_v55 = vpop.permute.xlu2 %160 }
 0x3b9   :  { %1096 = vmatmul.msk.f32.vlgmr.msrb.gmra.mxu2 %vm104_vm6, %v161_v55 }
 0x3ba   :  { %568 = vmatpush.msrb.mxu2 %v1322_v22 }
 0x3bc   :  { %569 = vmatpush.msrb.mxu2 %v1324_v23 }
 0x3be   :  { %570 = vmatpush.msrb.mxu2 %v1328_v24 }
 0x3c0   :  { %571 = vmatpush.msrb.mxu2 %v1338_v27 }
 0x43c   :  { %v181_v57 = vpop.f32.mrf.mxu2 }
 0x43d   :  { %v182_v58 = vadd.f32 %v1386_v56, %v181_v57 }
 0x43f   :  { %1153 = vtanh.f32 %v182_v58  ;;  %v1097_v60 = vmul.f32 -1.442695, %v182_v58 }
 0x441   :  { %1155 = vpow2.f32 %v1097_v60 }
 0x445   :  { %v1154_v59 = vpop.eup %1153 }
 0x446   :  { %205 = vrot.lane.b32.xlu0 %v1154_v59, %s1295_s1 }
 0x447   :  { %v1156_v61 = vpop.eup %1155 }
 0x448   :  { %v187_v62 = vadd.f32 1.0, %v1156_v61 }
 0x44a   :  { %1157 = vrcp.f32 %v187_v62  ;;  %v199_v4 = vand.u32 2147483648, %v187_v62  ;;  %vm193_vm12 = vweird.f32 %v187_v62  ;;  %v197_v5 = vand.u32 2147483647, %v187_v62 }
 0x44c   :  { %v200_v7 = vor.u32 1.1754944e-38, %v199_v4  ;;  %vm198_vm14 = vcmp.eq.f32.partialorder %v197_v5, 8.507059e+37 }
 0x450   :  { %v1158_v63 = vpop.eup %1157 }
 0x451   :  { %v189_v0 = vmul.f32 %v1158_v63, %v187_v62  ;;  %vm194_vm11 = vweird.f32 %v1158_v63 }
 0x452   :  { %vm195_vm13 = vmor %vm193_vm12, %vm194_vm11 }
 0x453   :  { %v190_v1 = vsub.f32 1.0, %v189_v0 }
 0x455   :  { %v191_v2 = vmul.f32 %v1158_v63, %v190_v1 }
 0x457   :  { %v192_v3 = vadd.f32 %v1158_v63, %v191_v2 }
 0x459   :  { %v196_v6 = vsel %vm195_vm13, %v1158_v63, %v192_v3  ;;  %vm957_vm13 = vcmask 1043456  }
 0x45a   :  { %v201_v9 = vsel %vm198_vm14, %v200_v7, %v196_v6 }
 0x4b8   :  { %v206_v8 = vpop.permute.xlu0 %205 }
 0x4b9   :  { %v208_v10 = vmul.f32 %v206_v8, %v201_v9 }
 0x4bb   :  { %1159 = vtanh.f32 %v208_v10 }
 0x4c1   :  { %v1160_v11 = vpop.eup %1159 }
 0x4c2   :  { %211 = vrot.lane.b32.xlu1 %v1160_v11, %s1296_s0 }
 0x534   :  { %v212_v12 = vpop.permute.xlu1 %211 }
 0x535   :  { %v214_v13 = vmul.f32 %v212_v12, %v201_v9 }
 0x537   :  { %216 = vrot.lane.b32.xlu2 %v214_v13, %s1297_s18 }
 0x591   :  { %v217_v14 = vpop.permute.xlu2 %216 }
 0x592   :  { %1098 = vmatmul.msk.f32.vlgmr.msrb.gmra.mxu3 %vm104_vm6, %v217_v14 }
 0x593   :  { %456 = vmatpush.msrb.mxu3 %v1322_v22 }
 0x595   :  { %457 = vmatpush.msrb.mxu3 %v1324_v23 }
 0x597   :  { %458 = vmatpush.msrb.mxu3 %v1328_v24 }
 0x599   :  { %459 = vmatpush.msrb.mxu3 %v1338_v27 }
 0x615   :  { %v237_v15 = vpop.f32.mrf.mxu3 }
 0x616   :  { %v238_v16 = vadd.f32 %v1348_v29, %v237_v15 }
 0x618   :  { %1161 = vtanh.f32 %v238_v16  ;;  %v1099_v18 = vmul.f32 -1.442695, %v238_v16 }
 0x61a   :  { %1163 = vpow2.f32 %v1099_v18 }
 0x61e   :  { %v1162_v17 = vpop.eup %1161 }
 0x61f   :  { %261 = vrot.lane.b32.xlu0 %v1162_v17, %s1295_s1 }
 0x620   :  { %v1164_v19 = vpop.eup %1163 }
 0x621   :  { %v243_v20 = vadd.f32 1.0, %v1164_v19 }
 0x623   :  { %1165 = vrcp.f32 %v243_v20  ;;  %v255_v31 = vand.u32 2147483648, %v243_v20  ;;  %vm249_vm1 = vweird.f32 %v243_v20  ;;  %v253_v32 = vand.u32 2147483647, %v243_v20 }
 0x625   :  { %v256_v34 = vor.u32 1.1754944e-38, %v255_v31  ;;  %vm254_vm3 = vcmp.eq.f32.partialorder %v253_v32, 8.507059e+37 }
 0x629   :  { %v1166_v21 = vpop.eup %1165 }
 0x62a   :  { %v245_v25 = vmul.f32 %v1166_v21, %v243_v20  ;;  %vm250_vm15 = vweird.f32 %v1166_v21 }
 0x62b   :  { %vm251_vm2 = vmor %vm249_vm1, %vm250_vm15 }
 0x62c   :  { %v246_v26 = vsub.f32 1.0, %v245_v25 }
 0x62e   :  { %v247_v28 = vmul.f32 %v1166_v21, %v246_v26 }
 0x630   :  { %v248_v30 = vadd.f32 %v1166_v21, %v247_v28 }
 0x632   :  { %v252_v33 = vsel %vm251_vm2, %v1166_v21, %v248_v30 }
 0x633   :  { %v257_v36 = vsel %vm254_vm3, %v256_v34, %v252_v33  ;;  %v964_v33 = vrot.slane %v1377_v54, 2 }
 0x691   :  { %v262_v35 = vpop.permute.xlu0 %261 }
 0x692   :  { %v264_v37 = vmul.f32 %v262_v35, %v257_v36 }
 0x694   :  { %1167 = vtanh.f32 %v264_v37 }
 0x69a   :  { %v1168_v38 = vpop.eup %1167 }
 0x69b   :  { %267 = vrot.lane.b32.xlu1 %v1168_v38, %s1296_s0 }
 0x70d   :  { %v268_v39 = vpop.permute.xlu1 %267 }
 0x70e   :  { %v1400_v40 = vmul.f32 %v268_v39, %v257_v36 }
 0x710   :  { %272 = vrot.lane.b32.xlu2 %v1400_v40, %s1297_s18  ;;  %v943_v30 = vrot.slane %v1400_v40, 6  ;;  %v976_v36 = vsel %vm45_vm0, %v964_v33, %v1400_v40 }
 0x712   :  { %v956_v37 = vsel %vm45_vm0, %v1377_v54, %v943_v30 }
 0x76a   :  { %v273_v41 = vpop.permute.xlu2 %272 }
 0x76b   :  { %1100 = vmatmul.msk.f32.vlgmr.msra.gmra.mxu0 %vm104_vm6, %v273_v41 }
 0x76c   :  { %736 = vmatpush.msra.mxu0 %v1353_v49 }
 0x76e   :  { %737 = vmatpush.msra.mxu0 %v1355_v50 }
 0x770   :  { %738 = vmatpush.msra.mxu0 %v1359_v51 }
 0x772   :  { %739 = vmatpush.msra.mxu0 %v1363_v52 }
 0x7e8   :  { %v293_v42 = vpop.f32.mrf.mxu0 }
 0x7e9   :  { %v294_v43 = vadd.f32 %v1386_v56, %v293_v42 }
 0x7eb   :  { %1169 = vtanh.f32 %v294_v43  ;;  %v1101_v45 = vmul.f32 -1.442695, %v294_v43 }
 0x7ed   :  { %1171 = vpow2.f32 %v1101_v45 }
 0x7f1   :  { %v1170_v44 = vpop.eup %1169 }
 0x7f2   :  { %317 = vrot.lane.b32.xlu0 %v1170_v44, %s1295_s1 }
 0x7f3   :  { %v1172_v46 = vpop.eup %1171 }
 0x7f4   :  { %v299_v47 = vadd.f32 1.0, %v1172_v46 }
 0x7f6   :  { %1173 = vrcp.f32 %v299_v47  ;;  %v311_v59 = vand.u32 2147483648, %v299_v47  ;;  %vm305_vm5 = vweird.f32 %v299_v47  ;;  %v309_v60 = vand.u32 2147483647, %v299_v47 }
 0x7f8   :  { %v312_v62 = vor.u32 1.1754944e-38, %v311_v59  ;;  %vm310_vm8 = vcmp.eq.f32.partialorder %v309_v60, 8.507059e+37 }
 0x7fc   :  { %v1174_v48 = vpop.eup %1173 }
 0x7fd   :  { %v301_v53 = vmul.f32 %v1174_v48, %v299_v47  ;;  %vm306_vm4 = vweird.f32 %v1174_v48 }
 0x7fe   :  { %vm307_vm7 = vmor %vm305_vm5, %vm306_vm4 }
 0x7ff   :  { %v302_v55 = vsub.f32 1.0, %v301_v53 }
 0x801   :  { %v303_v57 = vmul.f32 %v1174_v48, %v302_v55 }
 0x803   :  { %v304_v58 = vadd.f32 %v1174_v48, %v303_v57 }
 0x805   :  { %v308_v61 = vsel %vm307_vm7, %v1174_v48, %v304_v58 }
 0x806   :  { %v313_v0 = vsel %vm310_vm8, %v312_v62, %v308_v61  ;;  %vm959_vm8 = vcmask 1045504  }
 0x864   :  { %v318_v63 = vpop.permute.xlu0 %317 }
 0x865   :  { %v320_v1 = vmul.f32 %v318_v63, %v313_v0 }
 0x867   :  { %1175 = vtanh.f32 %v320_v1 }
 0x86d   :  { %v1176_v2 = vpop.eup %1175 }
 0x86e   :  { %323 = vrot.lane.b32.xlu1 %v1176_v2, %s1296_s0 }
 0x8e0   :  { %v324_v3 = vpop.permute.xlu1 %323 }
 0x8e1   :  { %v326_v4 = vmul.f32 %v324_v3, %v313_v0 }
 0x8e3   :  { %328 = vrot.lane.b32.xlu2 %v326_v4, %s1297_s18 }
 0x93d   :  { %v329_v5 = vpop.permute.xlu2 %328 }
 0x93e   :  { %1102 = vmatmul.msk.f32.vlgmr.msra.gmra.mxu3 %vm104_vm6, %v329_v5 }
 0x93f   :  { %680 = vmatpush.msra.mxu3 %v1322_v22 }
 0x941   :  { %681 = vmatpush.msra.mxu3 %v1324_v23 }
 0x943   :  { %682 = vmatpush.msra.mxu3 %v1328_v24 }
 0x945   :  { %683 = vmatpush.msra.mxu3 %v1338_v27 }
 0x9c1   :  { %v349_v6 = vpop.f32.mrf.mxu3 }
 0x9c2   :  { %v350_v7 = vadd.f32 %v1348_v29, %v349_v6 }
 0x9c4   :  { %1177 = vtanh.f32 %v350_v7  ;;  %v1103_v9 = vmul.f32 -1.442695, %v350_v7 }
 0x9c6   :  { %1179 = vpow2.f32 %v1103_v9 }
 0x9ca   :  { %v1178_v8 = vpop.eup %1177 }
 0x9cb   :  { %373 = vrot.lane.b32.xlu0 %v1178_v8, %s1295_s1 }
 0x9cc   :  { %v1180_v10 = vpop.eup %1179 }
 0x9cd   :  { %v355_v11 = vadd.f32 1.0, %v1180_v10 }
 0x9cf   :  { %1181 = vrcp.f32 %v355_v11  ;;  %v367_v17 = vand.u32 2147483648, %v355_v11  ;;  %vm361_vm10 = vweird.f32 %v355_v11  ;;  %v365_v18 = vand.u32 2147483647, %v355_v11 }
 0x9d1   :  { %v368_v20 = vor.u32 1.1754944e-38, %v367_v17  ;;  %vm366_vm12 = vcmp.eq.f32.partialorder %v365_v18, 8.507059e+37 }
 0x9d5   :  { %v1182_v12 = vpop.eup %1181 }
 0x9d6   :  { %v357_v13 = vmul.f32 %v1182_v12, %v355_v11  ;;  %vm362_vm9 = vweird.f32 %v1182_v12 }
 0x9d7   :  { %vm363_vm11 = vmor %vm361_vm10, %vm362_vm9 }
 0x9d8   :  { %v358_v14 = vsub.f32 1.0, %v357_v13 }
 0x9da   :  { %v359_v15 = vmul.f32 %v1182_v12, %v358_v14 }
 0x9dc   :  { %v360_v16 = vadd.f32 %v1182_v12, %v359_v15 }
 0x9de   :  { %v364_v19 = vsel %vm363_vm11, %v1182_v12, %v360_v16 }
 0x9df   :  { %v369_v25 = vsel %vm366_vm12, %v368_v20, %v364_v19 }
 0xa3d   :  { %v374_v21 = vpop.permute.xlu0 %373 }
 0xa3e   :  { %v376_v26 = vmul.f32 %v374_v21, %v369_v25 }
 0xa40   :  { %1183 = vtanh.f32 %v376_v26 }
 0xa46   :  { %v1184_v28 = vpop.eup %1183 }
 0xa47   :  { %379 = vrot.lane.b32.xlu1 %v1184_v28, %s1296_s0 }
 0xab9   :  { %v380_v31 = vpop.permute.xlu1 %379 }
 0xaba   :  { %v382_v32 = vmul.f32 %v380_v31, %v369_v25 }
 0xabc   :  { %v945_v34 = vrot.slane %v382_v32, 4  ;;  %v966_v35 = vrot.slane %v382_v32, 6  ;;  %384 = vrot.lane.b32.xlu2 %v382_v32, %s1297_s18 }
 0xabe   :  { %v1429_v38 = vsel %vm957_vm13, %v956_v37, %v945_v34  ;;  %v1432_v39 = vsel %vm957_vm13, %v976_v36, %v966_v35 }
 0xb16   :  { %v385_v41 = vpop.permute.xlu2 %384 }
 0xb17   :  { %1104 = vmatmul.msk.f32.vlgmr.msra.gmra.mxu2 %vm104_vm6, %v385_v41 }
 0xb18   :  { %624 = vmatpush.msra.mxu2 %v1353_v49 }
 0xb1a   :  { %625 = vmatpush.msra.mxu2 %v1355_v50 }
 0xb1c   :  { %626 = vmatpush.msra.mxu2 %v1359_v51 }
 0xb1e   :  { %627 = vmatpush.msra.mxu2 %v1363_v52 }
 0xb9a   :  { %v405_v40 = vpop.f32.mrf.mxu2 }
 0xb9b   :  { %v406_v54 = vadd.f32 %v1386_v56, %v405_v40 }
 0xb9d   :  { %1185 = vtanh.f32 %v406_v54  ;;  %v1105_v43 = vmul.f32 -1.442695, %v406_v54 }
 0xb9f   :  { %1187 = vpow2.f32 %v1105_v43 }
 0xba3   :  { %v1186_v42 = vpop.eup %1185 }
 0xba4   :  { %429 = vrot.lane.b32.xlu0 %v1186_v42, %s1295_s1 }
 0xba5   :  { %v1188_v44 = vpop.eup %1187 }
 0xba6   :  { %v411_v45 = vadd.f32 1.0, %v1188_v44 }
 0xba8   :  { %1189 = vrcp.f32 %v411_v45  ;;  %v423_v57 = vand.u32 2147483648, %v411_v45  ;;  %vm417_vm15 = vweird.f32 %v411_v45  ;;  %v421_v58 = vand.u32 2147483647, %v411_v45 }
 0xbaa   :  { %v424_v60 = vor.u32 1.1754944e-38, %v423_v57  ;;  %vm422_vm2 = vcmp.eq.f32.partialorder %v421_v58, 8.507059e+37 }
 0xbae   :  { %v1190_v46 = vpop.eup %1189 }
 0xbaf   :  { %v413_v47 = vmul.f32 %v1190_v46, %v411_v45  ;;  %vm418_vm14 = vweird.f32 %v1190_v46 }
 0xbb0   :  { %vm419_vm1 = vmor %vm417_vm15, %vm418_vm14 }
 0xbb1   :  { %v414_v48 = vsub.f32 1.0, %v413_v47 }
 0xbb3   :  { %v415_v53 = vmul.f32 %v1190_v46, %v414_v48 }
 0xbb5   :  { %v416_v55 = vadd.f32 %v1190_v46, %v415_v53 }
 0xbb7   :  { %v420_v59 = vsel %vm419_vm1, %v1190_v46, %v416_v55 }
 0xbb8   :  { %v425_v62 = vsel %vm422_vm2, %v424_v60, %v420_v59 }
 0xc16   :  { %v430_v61 = vpop.permute.xlu0 %429 }
 0xc17   :  { %v432_v63 = vmul.f32 %v430_v61, %v425_v62 }
 0xc19   :  { %1191 = vtanh.f32 %v432_v63 }
 0xc1f   :  { %v1192_v0 = vpop.eup %1191 }
 0xc20   :  { %435 = vrot.lane.b32.xlu1 %v1192_v0, %s1296_s0 }
 0xc92   :  { %v436_v1 = vpop.permute.xlu1 %435 }
 0xc93   :  { %v438_v2 = vmul.f32 %v436_v1, %v425_v62 }
 0xc95   :  { %440 = vrot.lane.b32.xlu2 %v438_v2, %s1297_s18 }
 0xcef   :  { %v441_v3 = vpop.permute.xlu2 %440 }
 0xcf0   :  { %1106 = vmatmul.msk.f32.vlgmr.msrb.gmra.mxu3 %vm104_vm6, %v441_v3 }
 0xcf1   :  { %904 = vmatpush.msrb.mxu3 %v1322_v22 }
 0xcf3   :  { %905 = vmatpush.msrb.mxu3 %v1324_v23 }
 0xcf5   :  { %906 = vmatpush.msrb.mxu3 %v1328_v24 }
 0xcf7   :  { %907 = vmatpush.msrb.mxu3 %v1338_v27 }
 0xd73   :  { %v461_v4 = vpop.f32.mrf.mxu3 }
 0xd74   :  { %v462_v5 = vadd.f32 %v1348_v29, %v461_v4 }
 0xd76   :  { %1193 = vtanh.f32 %v462_v5  ;;  %v1107_v7 = vmul.f32 -1.442695, %v462_v5 }
 0xd78   :  { %1195 = vpow2.f32 %v1107_v7 }
 0xd7c   :  { %v1194_v6 = vpop.eup %1193 }
 0xd7d   :  { %485 = vrot.lane.b32.xlu0 %v1194_v6, %s1295_s1 }
 0xd7e   :  { %v1196_v8 = vpop.eup %1195 }
 0xd7f   :  { %v467_v9 = vadd.f32 1.0, %v1196_v8 }
 0xd81   :  { %1197 = vrcp.f32 %v467_v9  ;;  %v479_v24 = vand.u32 2147483648, %v467_v9  ;;  %vm473_vm4 = vweird.f32 %v467_v9  ;;  %v477_v27 = vand.u32 2147483647, %v467_v9 }
 0xd83   :  { %v480_v14 = vor.u32 1.1754944e-38, %v479_v24  ;;  %vm478_vm7 = vcmp.eq.f32.partialorder %v477_v27, 8.507059e+37 }
 0xd87   :  { %v1198_v10 = vpop.eup %1197 }
 0xd88   :  { %v469_v22 = vmul.f32 %v1198_v10, %v467_v9  ;;  %vm474_vm3 = vweird.f32 %v1198_v10 }
 0xd89   :  { %vm475_vm5 = vmor %vm473_vm4, %vm474_vm3 }
 0xd8a   :  { %v470_v11 = vsub.f32 1.0, %v469_v22 }
 0xd8c   :  { %v471_v23 = vmul.f32 %v1198_v10, %v470_v11 }
 0xd8e   :  { %v472_v12 = vadd.f32 %v1198_v10, %v471_v23 }
 0xd90   :  { %v476_v13 = vsel %vm475_vm5, %v1198_v10, %v472_v12 }
 0xd91   :  { %v481_v16 = vsel %vm478_vm7, %v480_v14, %v476_v13 }
 0xdef   :  { %v486_v15 = vpop.permute.xlu0 %485 }
 0xdf0   :  { %v488_v17 = vmul.f32 %v486_v15, %v481_v16 }
 0xdf2   :  { %1199 = vtanh.f32 %v488_v17 }
 0xdf8   :  { %v1200_v18 = vpop.eup %1199 }
 0xdf9   :  { %491 = vrot.lane.b32.xlu1 %v1200_v18, %s1296_s0 }
 0xe6b   :  { %v492_v19 = vpop.permute.xlu1 %491 }
 0xe6c   :  { %v494_v20 = vmul.f32 %v492_v19, %v481_v16 }
 0xe6e   :  { %v947_v21 = vrot.slane %v494_v20, 2  ;;  %v968_v25 = vrot.slane %v494_v20, 4  ;;  %496 = vrot.lane.b32.xlu2 %v494_v20, %s1297_s18 }
 0xe70   :  { %v1454_v26 = vsel %vm959_vm8, %v1429_v38, %v947_v21  ;;  %v1458_v28 = vsel %vm959_vm8, %v1432_v39, %v968_v25 }
 0xec8   :  { %v497_v30 = vpop.permute.xlu2 %496 }
 0xec9   :  { %1108 = vmatmul.msk.f32.vlgmr.msrb.gmra.mxu0 %vm104_vm6, %v497_v30 }
 0xf46   :  { %v517_v31 = vpop.f32.mrf.mxu0 }
 0xf47   :  { %v518_v32 = vadd.f32 %v1386_v56, %v517_v31 }
 0xf49   :  { %1201 = vtanh.f32 %v518_v32  ;;  %v1109_v34 = vmul.f32 -1.442695, %v518_v32 }
 0xf4b   :  { %1203 = vpow2.f32 %v1109_v34 }
 0xf4f   :  { %v1202_v33 = vpop.eup %1201 }
 0xf50   :  { %541 = vrot.lane.b32.xlu0 %v1202_v33, %s1295_s1 }
 0xf51   :  { %v1204_v35 = vpop.eup %1203 }
 0xf52   :  { %v523_v36 = vadd.f32 1.0, %v1204_v35 }
 0xf54   :  { %1205 = vrcp.f32 %v523_v36  ;;  %v535_v54 = vand.u32 2147483648, %v523_v36  ;;  %vm529_vm10 = vweird.f32 %v523_v36  ;;  %v533_v42 = vand.u32 2147483647, %v523_v36 }
 0xf56   :  { %v536_v44 = vor.u32 1.1754944e-38, %v535_v54  ;;  %vm534_vm12 = vcmp.eq.f32.partialorder %v533_v42, 8.507059e+37 }
 0xf5a   :  { %v1206_v37 = vpop.eup %1205 }
 0xf5b   :  { %v525_v38 = vmul.f32 %v1206_v37, %v523_v36  ;;  %vm530_vm9 = vweird.f32 %v1206_v37 }
 0xf5c   :  { %vm531_vm11 = vmor %vm529_vm10, %vm530_vm9 }
 0xf5d   :  { %v526_v41 = vsub.f32 1.0, %v525_v38 }
 0xf5f   :  { %v527_v39 = vmul.f32 %v1206_v37, %v526_v41 }
 0xf61   :  { %v528_v40 = vadd.f32 %v1206_v37, %v527_v39 }
 0xf63   :  { %v532_v43 = vsel %vm531_vm11, %v1206_v37, %v528_v40 }
 0xf64   :  { %v537_v46 = vsel %vm534_vm12, %v536_v44, %v532_v43 }
 0xfc2   :  { %v542_v45 = vpop.permute.xlu0 %541 }
 0xfc3   :  { %v544_v47 = vmul.f32 %v542_v45, %v537_v46 }
 0xfc5   :  { %1207 = vtanh.f32 %v544_v47 }
 0xfcb   :  { %v1208_v48 = vpop.eup %1207 }
 0xfcc   :  { %547 = vrot.lane.b32.xlu1 %v1208_v48, %s1296_s0 }
0x103e   :  { %v548_v53 = vpop.permute.xlu1 %547 }
0x103f   :  { %v550_v55 = vmul.f32 %v548_v53, %v537_v46 }
0x1041   :  { %552 = vrot.lane.b32.xlu2 %v550_v55, %s1297_s18 }
0x109b   :  { %v553_v57 = vpop.permute.xlu2 %552 }
0x109c   :  { %1110 = vmatmul.msk.f32.vlgmr.msrb.gmra.mxu2 %vm104_vm6, %v553_v57 }
0x109d   :  { %848 = vmatpush.msrb.mxu2 %v1353_v49 }
0x109f   :  { %849 = vmatpush.msrb.mxu2 %v1355_v50 }
0x10a1   :  { %850 = vmatpush.msrb.mxu2 %v1359_v51 }
0x10a3   :  { %851 = vmatpush.msrb.mxu2 %v1363_v52 }
0x111f   :  { %v573_v58 = vpop.f32.mrf.mxu2 }
0x1120   :  { %v574_v59 = vadd.f32 %v1348_v29, %v573_v58 }
0x1122   :  { %1209 = vtanh.f32 %v574_v59  ;;  %v1111_v61 = vmul.f32 -1.442695, %v574_v59 }
0x1124   :  { %1211 = vpow2.f32 %v1111_v61 }
0x1128   :  { %v1210_v60 = vpop.eup %1209 }
0x1129   :  { %597 = vrot.lane.b32.xlu0 %v1210_v60, %s1295_s1 }
0x112a   :  { %v1212_v62 = vpop.eup %1211 }
0x112b   :  { %v579_v63 = vadd.f32 1.0, %v1212_v62 }
0x112d   :  { %1213 = vrcp.f32 %v579_v63  ;;  %v591_v51 = vand.u32 2147483648, %v579_v63  ;;  %vm585_vm15 = vweird.f32 %v579_v63  ;;  %v589_v52 = vand.u32 2147483647, %v579_v63 }
0x112f   :  { %v592_v4 = vor.u32 1.1754944e-38, %v591_v51  ;;  %vm590_vm2 = vcmp.eq.f32.partialorder %v589_v52, 8.507059e+37 }
0x1133   :  { %v1214_v0 = vpop.eup %1213 }
0x1134   :  { %v581_v49 = vmul.f32 %v1214_v0, %v579_v63  ;;  %vm586_vm14 = vweird.f32 %v1214_v0 }
0x1135   :  { %vm587_vm1 = vmor %vm585_vm15, %vm586_vm14 }
0x1136   :  { %v582_v1 = vsub.f32 1.0, %v581_v49 }
0x1138   :  { %v583_v50 = vmul.f32 %v1214_v0, %v582_v1 }
0x113a   :  { %v584_v2 = vadd.f32 %v1214_v0, %v583_v50 }
0x113c   :  { %v588_v3 = vsel %vm587_vm1, %v1214_v0, %v584_v2 }
0x113d   :  { %v593_v6 = vsel %vm590_vm2, %v592_v4, %v588_v3 }
0x119b   :  { %v598_v5 = vpop.permute.xlu0 %597 }
0x119c   :  { %v600_v7 = vmul.f32 %v598_v5, %v593_v6 }
0x119e   :  { %1215 = vtanh.f32 %v600_v7 }
0x11a4   :  { %v1216_v8 = vpop.eup %1215 }
0x11a5   :  { %603 = vrot.lane.b32.xlu1 %v1216_v8, %s1296_s0 }
0x1217   :  { %v604_v9 = vpop.permute.xlu1 %603 }
0x1218   :  { %v1473_v10 = vmul.f32 %v604_v9, %v593_v6 }
0x121a   :  { %608 = vrot.lane.b32.xlu2 %v1473_v10, %s1297_s18 }
0x1274   :  { %v609_v22 = vpop.permute.xlu2 %608 }
0x1275   :  { %1112 = vmatmul.msk.f32.vlgmr.msra.gmra.mxu2 %vm104_vm6, %v609_v22 }
0x12f8   :  { %v629_v11 = vpop.f32.mrf.mxu2 }
0x12f9   :  { %v630_v23 = vadd.f32 %v1386_v56, %v629_v11 }
0x12fb   :  { %1217 = vtanh.f32 %v630_v23  ;;  %v1113_v24 = vmul.f32 -1.442695, %v630_v23 }
0x12fd   :  { %1219 = vpow2.f32 %v1113_v24 }
0x1301   :  { %v1218_v12 = vpop.eup %1217 }
0x1302   :  { %653 = vrot.lane.b32.xlu0 %v1218_v12, %s1295_s1 }
0x1303   :  { %v1220_v27 = vpop.eup %1219 }
0x1304   :  { %v635_v13 = vadd.f32 1.0, %v1220_v27 }
0x1306   :  { %1221 = vrcp.f32 %v635_v13  ;;  %v647_v19 = vand.u32 2147483648, %v635_v13  ;;  %vm641_vm4 = vweird.f32 %v635_v13  ;;  %v645_v20 = vand.u32 2147483647, %v635_v13 }
0x1308   :  { %v648_v25 = vor.u32 1.1754944e-38, %v647_v19  ;;  %vm646_vm7 = vcmp.eq.f32.partialorder %v645_v20, 8.507059e+37 }
0x130c   :  { %v1222_v14 = vpop.eup %1221 }
0x130d   :  { %v637_v15 = vmul.f32 %v1222_v14, %v635_v13  ;;  %vm642_vm3 = vweird.f32 %v1222_v14 }
0x130e   :  { %vm643_vm5 = vmor %vm641_vm4, %vm642_vm3 }
0x130f   :  { %v638_v16 = vsub.f32 1.0, %v637_v15 }
0x1311   :  { %v639_v17 = vmul.f32 %v1222_v14, %v638_v16 }
0x1313   :  { %v640_v18 = vadd.f32 %v1222_v14, %v639_v17 }
0x1315   :  { %v644_v21 = vsel %vm643_vm5, %v1222_v14, %v640_v18 }
0x1316   :  { %v649_v31 = vsel %vm646_vm7, %v648_v25, %v644_v21 }
0x1374   :  { %v654_v30 = vpop.permute.xlu0 %653 }
0x1375   :  { %v656_v32 = vmul.f32 %v654_v30, %v649_v31 }
0x1377   :  { %1223 = vtanh.f32 %v656_v32 }
0x137d   :  { %v1224_v33 = vpop.eup %1223 }
0x137e   :  { %659 = vrot.lane.b32.xlu1 %v1224_v33, %s1296_s0 }
0x13f0   :  { %v660_v34 = vpop.permute.xlu1 %659 }
0x13f1   :  { %v662_v35 = vmul.f32 %v660_v34, %v649_v31 }
0x13f3   :  { %664 = vrot.lane.b32.xlu2 %v662_v35, %s1297_s18 }
0x144d   :  { %v665_v36 = vpop.permute.xlu2 %664 }
0x144e   :  { %1114 = vmatmul.msk.f32.vlgmr.msra.gmra.mxu3 %vm104_vm6, %v665_v36 }
0x14d1   :  { %v685_v37 = vpop.f32.mrf.mxu3 }
0x14d2   :  { %v686_v38 = vadd.f32 %v1348_v29, %v685_v37 }
0x14d4   :  { %1225 = vtanh.f32 %v686_v38  ;;  %v1115_v39 = vmul.f32 -1.442695, %v686_v38 }
0x14d6   :  { %1227 = vpow2.f32 %v1115_v39 }
0x14da   :  { %v1226_v41 = vpop.eup %1225 }
0x14db   :  { %709 = vrot.lane.b32.xlu0 %v1226_v41, %s1295_s1 }
0x14dc   :  { %v1228_v40 = vpop.eup %1227 }
0x14dd   :  { %v691_v54 = vadd.f32 1.0, %v1228_v40 }
0x14df   :  { %1229 = vrcp.f32 %v691_v54  ;;  %v703_v47 = vand.u32 2147483648, %v691_v54  ;;  %vm697_vm10 = vweird.f32 %v691_v54  ;;  %v701_v48 = vand.u32 2147483647, %v691_v54 }
0x14e1   :  { %v704_v55 = vor.u32 1.1754944e-38, %v703_v47  ;;  %vm702_vm12 = vcmp.eq.f32.partialorder %v701_v48, 8.507059e+37 }
0x14e5   :  { %v1230_v42 = vpop.eup %1229 }
0x14e6   :  { %v693_v43 = vmul.f32 %v1230_v42, %v691_v54  ;;  %vm698_vm9 = vweird.f32 %v1230_v42 }
0x14e7   :  { %vm699_vm11 = vmor %vm697_vm10, %vm698_vm9 }
0x14e8   :  { %v694_v44 = vsub.f32 1.0, %v693_v43 }
0x14ea   :  { %v695_v45 = vmul.f32 %v1230_v42, %v694_v44 }
0x14ec   :  { %v696_v46 = vadd.f32 %v1230_v42, %v695_v45 }
0x14ee   :  { %v700_v53 = vsel %vm699_vm11, %v1230_v42, %v696_v46  ;;  %v970_v42 = vrot.slane %v1473_v10, 2 }
0x14ef   :  { %v705_v58 = vsel %vm702_vm12, %v704_v55, %v700_v53 }
0x154d   :  { %v710_v57 = vpop.permute.xlu0 %709 }
0x154e   :  { %v712_v59 = vmul.f32 %v710_v57, %v705_v58 }
0x1550   :  { %1231 = vtanh.f32 %v712_v59 }
0x1556   :  { %v1232_v60 = vpop.eup %1231 }
0x1557   :  { %715 = vrot.lane.b32.xlu1 %v1232_v60, %s1296_s0 }
0x15c9   :  { %v716_v61 = vpop.permute.xlu1 %715 }
0x15ca   :  { %v1486_v62 = vmul.f32 %v716_v61, %v705_v58 }
0x15cc   :  { %720 = vrot.lane.b32.xlu2 %v1486_v62, %s1297_s18  ;;  %v949_v39 = vrot.slane %v1486_v62, 6  ;;  %v979_v45 = vsel %vm45_vm0, %v970_v42, %v1486_v62 }
0x15ce   :  { %v961_v46 = vsel %vm45_vm0, %v1473_v10, %v949_v39 }
0x1626   :  { %v721_v63 = vpop.permute.xlu2 %720 }
0x1627   :  { %1116 = vmatmul.msk.f32.vlgmr.msra.gmra.mxu0 %vm104_vm6, %v721_v63 }
0x16a4   :  { %v741_v0 = vpop.f32.mrf.mxu0 }
0x16a5   :  { %v742_v49 = vadd.f32 %v1386_v56, %v741_v0 }
0x16a7   :  { %1233 = vtanh.f32 %v742_v49  ;;  %v1117_v50 = vmul.f32 -1.442695, %v742_v49 }
0x16a9   :  { %1235 = vpow2.f32 %v1117_v50 }
0x16ad   :  { %v1234_v1 = vpop.eup %1233 }
0x16ae   :  { %765 = vrot.lane.b32.xlu0 %v1234_v1, %s1295_s1 }
0x16af   :  { %v1236_v2 = vpop.eup %1235 }
0x16b0   :  { %v747_v51 = vadd.f32 1.0, %v1236_v2 }
0x16b2   :  { %1237 = vrcp.f32 %v747_v51  ;;  %v759_v7 = vand.u32 2147483648, %v747_v51  ;;  %vm753_vm15 = vweird.f32 %v747_v51  ;;  %v757_v8 = vand.u32 2147483647, %v747_v51 }
0x16b4   :  { %v760_v22 = vor.u32 1.1754944e-38, %v759_v7  ;;  %vm758_vm2 = vcmp.eq.f32.partialorder %v757_v8, 8.507059e+37  ;;  %v1007_v8 = vld [vmem:[#allocation2 + $0x80] sm:$0xff] }
0x16b5   :  { %1025 = vmatpush.msrb.mxu0 %v1007_v8 }
0x16b8   :  { %v1238_v52 = vpop.eup %1237 }
0x16b9   :  { %v749_v3 = vmul.f32 %v1238_v52, %v747_v51  ;;  %vm754_vm14 = vweird.f32 %v1238_v52 }
0x16ba   :  { %vm755_vm1 = vmor %vm753_vm15, %vm754_vm14 }
0x16bb   :  { %v750_v4 = vsub.f32 1.0, %v749_v3 }
0x16bd   :  { %v751_v5 = vmul.f32 %v1238_v52, %v750_v4 }
0x16bf   :  { %v752_v6 = vadd.f32 %v1238_v52, %v751_v5 }
0x16c1   :  { %v756_v9 = vsel %vm755_vm1, %v1238_v52, %v752_v6  ;;  %vm1010_vm1 = vcmask 523264  }
0x16c2   :  { %v761_v23 = vsel %vm758_vm2, %v760_v22, %v756_v9  ;;  %v1006_v9 = vld [vmem:[#allocation2 + $0x78] sm:$0xff]  ;;  %v1005_v22 = vld [vmem:[#allocation2 + $0x70] sm:$0xff]  ;;  %vm1083_vm2 = vcmask 31744  }
0x16c3   :  { %1026 = vmatpush.msrb.mxu0 %v1006_v9 }
0x16c5   :  { %1027 = vmatpush.msrb.mxu0 %v1005_v22 }
0x1720   :  { %v766_v11 = vpop.permute.xlu0 %765 }
0x1721   :  { %v768_v12 = vmul.f32 %v766_v11, %v761_v23 }
0x1723   :  { %1239 = vtanh.f32 %v768_v12 }
0x1729   :  { %v1240_v24 = vpop.eup %1239 }
0x172a   :  { %771 = vrot.lane.b32.xlu1 %v1240_v24, %s1296_s0 }
0x179c   :  { %v772_v27 = vpop.permute.xlu1 %771 }
0x179d   :  { %v774_v13 = vmul.f32 %v772_v27, %v761_v23  ;;  %v1265_v23 = vld [vmem:[#allocation2 + $0x10a] ss:$0 sm:$0xff] }
0x179f   :  { %776 = vrot.lane.b32.xlu2 %v774_v13, %s1297_s18 }
0x17f9   :  { %v777_v14 = vpop.permute.xlu2 %776 }
0x17fa   :  { %1118 = vmatmul.msk.f32.vlgmr.msra.gmra.mxu1 %vm104_vm6, %v777_v14  ;;  %v1004_v14 = vld [vmem:[#allocation2 + $0x68] sm:$0xff] }
0x17fb   :  { %1028 = vmatpush.msrb.mxu0 %v1004_v14 }
0x1877   :  { %v797_v15 = vpop.f32.mrf.mxu1 }
0x1878   :  { %v798_v16 = vadd.f32 %v1348_v29, %v797_v15  ;;  %v1003_v15 = vld [vmem:[#allocation2 + $0x60] sm:$0xff] }
0x1879   :  { %1029 = vmatpush.msrb.mxu0 %v1003_v15 }
0x187a   :  { %1241 = vtanh.f32 %v798_v16  ;;  %v1119_v18 = vmul.f32 -1.442695, %v798_v16  ;;  %v1002_v16 = vld [vmem:[#allocation2 + $0x58] sm:$0xff] }
0x187b   :  { %1030 = vmatpush.msrb.mxu0 %v1002_v16 }
0x187c   :  { %1243 = vpow2.f32 %v1119_v18  ;;  %v1000_v18 = vld [vmem:[#allocation2 + $0x48] sm:$0xff] }
0x1880   :  { %v1242_v17 = vpop.eup %1241 }
0x1881   :  { %821 = vrot.lane.b32.xlu0 %v1242_v17, %s1295_s1  ;;  %v1001_v17 = vld [vmem:[#allocation2 + $0x50] sm:$0xff] }
0x1882   :  { %v1244_v19 = vpop.eup %1243  ;;  %1031 = vmatpush.msrb.mxu0 %v1001_v17 }
0x1883   :  { %v803_v20 = vadd.f32 1.0, %v1244_v19 }
0x1884   :  { %1032 = vmatpush.msrb.mxu0 %v1000_v18 }
0x1885   :  { %1245 = vrcp.f32 %v803_v20  ;;  %v815_v33 = vand.u32 2147483648, %v803_v20  ;;  %vm809_vm4 = vweird.f32 %v803_v20  ;;  %v813_v34 = vand.u32 2147483647, %v803_v20 }
0x1887   :  { %v816_v35 = vor.u32 1.1754944e-38, %v815_v33  ;;  %vm814_vm7 = vcmp.eq.f32.partialorder %v813_v34, 8.507059e+37  ;;  %v1052_v33 = vld [vmem:[#allocation2 + $0xd8] sm:$0xff]  ;;  %v1051_v34 = vld [vmem:[#allocation2 + $0xd0] sm:$0xff] }
0x188b   :  { %v1246_v21 = vpop.eup %1245 }
0x188c   :  { %v805_v25 = vmul.f32 %v1246_v21, %v803_v20  ;;  %vm810_vm3 = vweird.f32 %v1246_v21  ;;  %v1057_v20 = vld [vmem:[#allocation2 + $0x100] sm:$0xff] }
0x188d   :  { %vm811_vm5 = vmor %vm809_vm4, %vm810_vm3  ;;  %1060 = vmatpush.msrb.mxu1 %v1057_v20 }
0x188e   :  { %v806_v30 = vsub.f32 1.0, %v805_v25 }
0x1890   :  { %v807_v31 = vmul.f32 %v1246_v21, %v806_v30  ;;  %v1054_v30 = vld [vmem:[#allocation2 + $0xe8] sm:$0xff] }
0x1892   :  { %v808_v32 = vadd.f32 %v1246_v21, %v807_v31  ;;  %v1053_v31 = vld [vmem:[#allocation2 + $0xe0] sm:$0xff] }
0x1894   :  { %v812_v29 = vsel %vm811_vm5, %v1246_v21, %v808_v32  ;;  %v1056_v21 = vld [vmem:[#allocation2 + $0xf8] sm:$0xff] }
0x1895   :  { %v817_v37 = vsel %vm814_vm7, %v816_v35, %v812_v29  ;;  %1061 = vmatpush.msrb.mxu1 %v1056_v21  ;;  %v1050_v35 = vld [vmem:[#allocation2 + $0xc8] sm:$0xff] }
0x18f3   :  { %v822_v36 = vpop.permute.xlu0 %821 }
0x18f4   :  { %v824_v38 = vmul.f32 %v822_v36, %v817_v37 }
0x18f6   :  { %1247 = vtanh.f32 %v824_v38 }
0x18fc   :  { %v1248_v41 = vpop.eup %1247 }
0x18fd   :  { %827 = vrot.lane.b32.xlu1 %v1248_v41, %s1296_s0 }
0x196f   :  { %v828_v40 = vpop.permute.xlu1 %827 }
0x1970   :  { %v830_v54 = vmul.f32 %v828_v40, %v817_v37 }
0x1972   :  { %v951_v43 = vrot.slane %v830_v54, 4  ;;  %v972_v44 = vrot.slane %v830_v54, 6  ;;  %832 = vrot.lane.b32.xlu2 %v830_v54, %s1297_s18 }
0x1974   :  { %v1507_v47 = vsel %vm957_vm13, %v961_v46, %v951_v43  ;;  %v1510_v48 = vsel %vm957_vm13, %v979_v45, %v972_v44 }
0x19cc   :  { %v833_v53 = vpop.permute.xlu2 %832 }
0x19cd   :  { %1120 = vmatmul.msk.f32.vlgmr.msrb.gmra.mxu2 %vm104_vm6, %v833_v53  ;;  %v1049_v53 = vld [vmem:[#allocation2 + $0xc0] sm:$0xff] }
0x1a50   :  { %v853_v55 = vpop.f32.mrf.mxu2 }
0x1a51   :  { %v854_v57 = vadd.f32 %v1386_v56, %v853_v55  ;;  %v1048_v55 = vld [vmem:[#allocation2 + $0xb8] sm:$0xff] }
0x1a53   :  { %1249 = vtanh.f32 %v854_v57  ;;  %v1121_v59 = vmul.f32 -1.442695, %v854_v57  ;;  %v1047_v57 = vld [vmem:[#allocation2 + $0xb0] sm:$0xff] }
0x1a55   :  { %1251 = vpow2.f32 %v1121_v59  ;;  %v1045_v59 = vld [vmem:[#allocation2 + $0xa0] sm:$0xff] }
0x1a59   :  { %v1250_v58 = vpop.eup %1249 }
0x1a5a   :  { %877 = vrot.lane.b32.xlu0 %v1250_v58, %s1295_s1  ;;  %v1046_v58 = vld [vmem:[#allocation2 + $0xa8] sm:$0xff] }
0x1a5b   :  { %v1252_v60 = vpop.eup %1251 }
0x1a5c   :  { %v859_v10 = vadd.f32 1.0, %v1252_v60  ;;  %v1044_v60 = vld [vmem:[#allocation2 + $0x98] sm:$0xff] }
0x1a5e   :  { %1253 = vrcp.f32 %v859_v10  ;;  %v871_v1 = vand.u32 2147483648, %v859_v10  ;;  %vm865_vm13 = vweird.f32 %v859_v10  ;;  %v869_v50 = vand.u32 2147483647, %v859_v10 }
0x1a60   :  { %v872_v2 = vor.u32 1.1754944e-38, %v871_v1  ;;  %vm870_vm10 = vcmp.eq.f32.partialorder %v869_v50, 8.507059e+37 }
0x1a64   :  { %v1254_v61 = vpop.eup %1253 }
0x1a65   :  { %v861_v62 = vmul.f32 %v1254_v61, %v859_v10  ;;  %vm866_vm0 = vweird.f32 %v1254_v61  ;;  %v1043_v10 = vld [vmem:[#allocation2 + $0x90] sm:$0xff] }
0x1a66   :  { %vm867_vm9 = vmor %vm865_vm13, %vm866_vm0 }
0x1a67   :  { %v862_v63 = vsub.f32 1.0, %v861_v62 }
0x1a69   :  { %v863_v0 = vmul.f32 %v1254_v61, %v862_v63 }
0x1a6b   :  { %v864_v49 = vadd.f32 %v1254_v61, %v863_v0 }
0x1a6d   :  { %v868_v56 = vsel %vm867_vm9, %v1254_v61, %v864_v49  ;;  %v1042_v61 = vld [vmem:[#allocation2 + $0x88] sm:$0xff] }
0x1a6e   :  { %v873_v52 = vsel %vm870_vm10, %v872_v2, %v868_v56  ;;  %v1135_v56 = vld [vmem:[#allocation2 + $0x10b] ss:$0 sm:$0xff] }
0x1acc   :  { %v878_v51 = vpop.permute.xlu0 %877 }
0x1acd   :  { %v880_v3 = vmul.f32 %v878_v51, %v873_v52 }
0x1acf   :  { %1255 = vtanh.f32 %v880_v3 }
0x1ad5   :  { %v1256_v4 = vpop.eup %1255 }
0x1ad6   :  { %883 = vrot.lane.b32.xlu1 %v1256_v4, %s1296_s0 }
0x1b48   :  { %v884_v5 = vpop.permute.xlu1 %883 }
0x1b49   :  { %v886_v6 = vmul.f32 %v884_v5, %v873_v52 }
0x1b4b   :  { %888 = vrot.lane.b32.xlu2 %v886_v6, %s1297_s18  ;;  %v1136_v6 = vld [vmem:[#allocation2 + $0x10c] ss:$0 sm:$0xff] }
0x1b53   :  { %984 = vrot.lane.b32.xlu2 %v1454_v26, %s1297_s18 }
0x1ba5   :  { %v889_v7 = vpop.permute.xlu2 %888 }
0x1ba6   :  { %1122 = vmatmul.msk.f32.vlgmr.msrb.gmra.mxu3 %vm104_vm6, %v889_v7 }
0x1bad   :  { %v985_v43 = vpop.permute.xlu2 %984 }
0x1c29   :  { %v909_v11 = vpop.f32.mrf.mxu3 }
0x1c2a   :  { %v910_v12 = vadd.f32 %v1265_v23, %v909_v11 }
0x1c2c   :  { %1257 = vtanh.f32 %v910_v12  ;;  %v1123_v26 = vmul.f32 -1.442695, %v910_v12 }
0x1c2e   :  { %1259 = vpow2.f32 %v1123_v26 }
0x1c32   :  { %v1258_v24 = vpop.eup %1257 }
0x1c33   :  { %933 = vrot.lane.b32.xlu0 %v1258_v24, %s1295_s1 }
0x1c34   :  { %v1260_v27 = vpop.eup %1259 }
0x1c35   :  { %v915_v13 = vadd.f32 1.0, %v1260_v27 }
0x1c37   :  { %1261 = vrcp.f32 %v915_v13  ;;  %v927_v37 = vand.u32 2147483648, %v915_v13  ;;  %vm921_vm12 = vweird.f32 %v915_v13  ;;  %v925_v38 = vand.u32 2147483647, %v915_v13 }
0x1c39   :  { %v928_v39 = vor.u32 1.1754944e-38, %v927_v37  ;;  %vm926_vm15 = vcmp.eq.f32.partialorder %v925_v38, 8.507059e+37 }
0x1c3b   :  { %992 = vrot.lane.b32.xlu0 %v1458_v28, %s1295_s1  ;;  %v1055_v28 = vld [vmem:[#allocation2 + $0xf0] sm:$0xff] }
0x1c3c   :  { %1062 = vmatpush.msrb.mxu1 %v1055_v28 }
0x1c3d   :  { %v1262_v19 = vpop.eup %1261 }
0x1c3e   :  { %v917_v25 = vmul.f32 %v1262_v19, %v915_v13  ;;  %1063 = vmatpush.msrb.mxu1 %v1054_v30  ;;  %vm922_vm11 = vweird.f32 %v1262_v19 }
0x1c3f   :  { %vm923_vm14 = vmor %vm921_vm12, %vm922_vm11 }
0x1c40   :  { %v918_v32 = vsub.f32 1.0, %v917_v25  ;;  %1064 = vmatpush.msrb.mxu1 %v1053_v31 }
0x1c42   :  { %v919_v29 = vmul.f32 %v1262_v19, %v918_v32  ;;  %1065 = vmatpush.msrb.mxu1 %v1052_v33 }
0x1c44   :  { %1066 = vmatpush.msrb.mxu1 %v1051_v34  ;;  %v920_v36 = vadd.f32 %v1262_v19, %v919_v29 }
0x1c46   :  { %1067 = vmatpush.msrb.mxu1 %v1050_v35  ;;  %v924_v41 = vsel %vm923_vm14, %v1262_v19, %v920_v36 }
0x1c47   :  { %v929_v54 = vsel %vm926_vm15, %v928_v39, %v924_v41 }
0x1c48   :  { %1068 = vmatpush.msrb.mxu1 %v1049_v53 }
0x1c4a   :  { %1069 = vmatpush.msrb.mxu1 %v1048_v55 }
0x1c4c   :  { %1070 = vmatpush.msrb.mxu1 %v1047_v57 }
0x1c4e   :  { %1071 = vmatpush.msrb.mxu1 %v1046_v58 }
0x1c50   :  { %1072 = vmatpush.msrb.mxu1 %v1045_v59 }
0x1c52   :  { %1073 = vmatpush.msrb.mxu1 %v1044_v60 }
0x1c54   :  { %1074 = vmatpush.msrb.mxu1 %v1043_v10 }
0x1c56   :  { %1075 = vmatpush.msrb.mxu1 %v1042_v61 }
0x1ca5   :  { %v934_v40 = vpop.permute.xlu0 %933 }
0x1ca6   :  { %v936_v42 = vmul.f32 %v934_v40, %v929_v54 }
0x1ca8   :  { %1263 = vtanh.f32 %v936_v42 }
0x1cad   :  { %v993_v44 = vpop.permute.xlu0 %992 }
0x1cae   :  { %v1264_v45 = vpop.eup %1263  ;;  %v998_v46 = vsel %vm104_vm6, %v985_v43, %v993_v44 }
0x1caf   :  { %939 = vrot.lane.b32.xlu1 %v1264_v45, %s1296_s0  ;;  %1124 = vmatmul.msk.f32.vlgmr.msrb.gmra.mxu0 %vm1010_vm1, %v998_v46 }
0x1d21   :  { %v940_v62 = vpop.permute.xlu1 %939 }
0x1d22   :  { %v942_v63 = vmul.f32 %v940_v62, %v929_v54 }
0x1d24   :  { %v954_v0 = vrot.slane %v942_v63, 2  ;;  %v974_v49 = vrot.slane %v942_v63, 4 }
0x1d26   :  { %v963_v1 = vsel %vm959_vm8, %v1507_v47, %v954_v0  ;;  %v981_v50 = vsel %vm959_vm8, %v1510_v48, %v974_v49 }
0x1d27   :  { %986 = vrot.lane.b32.xlu1 %v963_v1, %s1297_s18  ;;  %994 = vrot.lane.b32.xlu2 %v981_v50, %s1295_s1 }
0x1d2c   :  { %v1034_v2 = vpop.f32.mrf.mxu0 }
0x1d2d   :  { %v1035_v51 = vadd.f32 %v1135_v56, %v1034_v2 }
0x1d2f   :  { %v1040_v52 = vmax.f32 %v1035_v51, 0.0 }
0x1d31   :  { %1076 = vmatmul.f32.vlgmr.msrb.gmra.mxu1 %v1040_v52 }
0x1d81   :  { %v995_v3 = vpop.permute.xlu2 %994 }
0x1d99   :  { %v987_v4 = vpop.permute.xlu1 %986 }
0x1d9a   :  { %v999_v5 = vsel %vm104_vm6, %v987_v4, %v995_v3 }
0x1d9b   :  { %1125 = vmatmul.msk.f32.gmra.mxu0 %vm1010_vm1, %v999_v5 }
0x1dae   :  { %v1077_v47 = vpop.f32.mrf.mxu1 }
0x1daf   :  { %v1078_v7 = vadd.f32 %v1136_v6, %v1077_v47 }
0x1db1   :  { %1084 = vst.msk [vmem:[%s1542_s2] sm:$0xff] %vm1083_vm2, %v1078_v7 }
0x1e18   :  { %v1037_v48 = vpop.f32.mrf.mxu0 }
0x1e19   :  { %v1038_v8 = vadd.f32 %v1135_v56, %v1037_v48 }
0x1e1b   :  { %v1041_v9 = vmax.f32 %v1038_v8, 0.0 }
0x1e1d   :  { %1079 = vmatmul.f32.gmra.mxu1 %v1041_v9 }
0x1e9a   :  { %v1080_v22 = vpop.f32.mrf.mxu1 }
0x1e9b   :  { %v1081_v11 = vadd.f32 %v1136_v6, %v1080_v22 }
0x1e9d   :  { %1085 = vst.msk [vmem:[%s1542_s2 + $0x8] sm:$0xff] %vm1083_vm2, %v1081_v11 }
0x1e9e   :  { %1090 = vsyncpa [#allocation3], 1 }

</bundles_post_ra>
